<compile_context>
chip_gen: v6e
topology: v6e:2x2x1
jax: 0.10.0
libtpu: 0.0.40
codegen_flags: <defaults>
</compile_context>

<pallas_src>
import jax
import jax.numpy as jnp
from jax.experimental import pallas as pl
from jax.experimental.pallas import tpu as pltpu

NEG_SLOPE = 0.01          # PyTorch F.leaky_relu default


def _leaky_relu(x):
    return jnp.where(x > 0, x, NEG_SLOPE * x)


def _vmem_limit_bytes():
    """Generation-aware scoped-VMEM limit (~48 MiB on v7x, ~96 MiB on v5e/v6e)."""
    cap = 64 * 1024 * 1024
    try:
        cap = int(getattr(pltpu.get_tpu_info(), "vmem_capacity_bytes", cap))
    except Exception:
        pass
    return int(min(cap - cap // 4, 112 * 1024 * 1024))


def _pick_tile(n, target, mult):
    """Largest divisor of n that is a multiple of `mult` and <= target; else n (full)."""
    best = None
    for d in range(mult, min(n, target) + 1, mult):
        if n % d == 0:
            best = d
    return best if best is not None else n


def _choose_tiles(batch, n, d1, d3, dout, edge_itemsize, budget):
    """Pick (receiver_tile TI, sender_tile TJ) within the per-step VMEM budget."""
    def fits(ti, tj):
        dbuf = 2 * (d3 + 1) * ti * tj * edge_itemsize           # edge_attr + adj (double-buffered)
        dbuf += 2 * 4 * (ti * d1 + d1 * tj + ti * dout)         # node-info tiles + output tile
        live = 4 * 8 * ti * tj                                  # live (TI,TJ) f32 slabs
        return dbuf + live <= budget

    ti = _pick_tile(n, 256, 8)
    tj = _pick_tile(n, 512, 128)
    while not fits(ti, tj):
        new_tj = _pick_tile(n, tj // 2, 128) if tj > 128 else tj
        if new_tj < tj:
            tj = new_tj
            continue
        new_ti = _pick_tile(n, ti // 2, 8) if ti > 8 else ti
        if new_ti < ti:
            ti = new_ti
            continue
        break  # no smaller legal tile (awkward N); fall back to full extents
    # Keep >= 2 parallel grid steps when there is no batch parallelism so both
    # TensorCores get work and the DMA pipeline has something to overlap with.
    if batch == 1 and ti == n and n >= 16:
        smaller = _pick_tile(n, n // 2, 8)
        if smaller < n:
            ti = smaller
    return ti, tj


def gin_layer_kernel(ni_r_ref, ni_st_ref, ea_ref, adj_ref,
                     w_ea_ref, w_er_ref, w_est_ref, b_e_ref,
                     w_nn_ref, w_ne_ref, b_n_ref,
                     out_ref, acc_ref):
    """One (batch, receiver-tile, sender-chunk) grid step of GraphInteractionLayer.

    ni_r_ref  : (1, TI, D1)      receiver-side node_info tile
    ni_st_ref : (1, D1, TJ)      sender-side node_info chunk (transposed)
    ea_ref    : (1, D3, TI, TJ)  edge_attr tile, D3-major (senders on lanes)
    adj_ref   : (1, TI, TJ)      adjacency tile
    w_ea_ref  : (E, D3)          edge weight, edge_attr slice
    w_er_ref  : (D1, E)          edge weight, receiver slice
    w_est_ref : (E, D1)          edge weight, sender slice (transposed)
    b_e_ref   : (1, E)           edge bias (folded into the receiver term)
    w_nn_ref  : (D1, Dout)       node weight, node_info slice
    w_ne_ref  : (E, Dout)        node weight, edge_agg slice
    b_n_ref   : (1, Dout)        node bias
    out_ref   : (1, TI, Dout)
    acc_ref   : (TI, E) f32      edge_agg accumulator across sender chunks
    """
    j = pl.program_id(2)
    f32 = jnp.float32
    _, TI, D1 = ni_r_ref.shape
    TJ = adj_ref.shape[2]
    D3 = ea_ref.shape[1]
    E = w_er_ref.shape[1]
    Dout = w_nn_ref.shape[1]

    @pl.when(j == 0)
    def _init():
        acc_ref[...] = jnp.zeros_like(acc_ref)

    ni_r = ni_r_ref[...].reshape(TI, D1)
    ni_st = ni_st_ref[...].reshape(D1, TJ)
    adj = adj_ref[...].reshape(TI, TJ).astype(f32)
    ea = ea_ref[...].astype(f32).reshape(D3, TI, TJ)
    w_ea = w_ea_ref[...]                                             # (E, D3) tiny

    # Receiver projection (+ edge bias, added once per receiver): (TI, E).
    recv = jnp.dot(ni_r, w_er_ref[...], preferred_element_type=f32) + b_e_ref[...]
    # Sender projection in sender-on-lanes layout: (E, TJ).
    send = jnp.dot(w_est_ref[...], ni_st, preferred_element_type=f32)

    # Edge MLP + leaky_relu + adjacency-masked reduction over senders (lanes),
    # one edge-code channel at a time.  Every intermediate is a dense (TI, TJ)
    # slab; nothing of shape (TI, TJ, E) is ever materialized and the mask is
    # fused into the reduction.  The tiny D3 contraction runs as broadcast MACs
    # on the VPU (the MXU handles the projections and the node MLP).
    cols = []
    for e in range(E):
        pre = recv[:, e:e + 1] + send[e:e + 1, :]                    # (TI, TJ)
        for d in range(D3):
            pre = pre + w_ea[e:e + 1, d:d + 1] * ea[d]
        ecode = _leaky_relu(pre)
        cols.append(jnp.sum(ecode * adj, axis=1, keepdims=True))     # (TI, 1)
    acc_ref[...] += jnp.concatenate(cols, axis=1)                    # (TI, E)

    # Node MLP + trailing leaky_relu once all sender chunks are aggregated.
    @pl.when(j == pl.num_programs(2) - 1)
    def _finalize():
        new_node = (jnp.dot(ni_r, w_nn_ref[...], preferred_element_type=f32)
                    + jnp.dot(acc_ref[...], w_ne_ref[...], preferred_element_type=f32)
                    + b_n_ref[...])
        out_ref[...] = _leaky_relu(new_node).reshape(1, TI, Dout).astype(out_ref.dtype)


def gin_forward(x, node_attr, edge_attr, adj, params, *, edge_in_bf16=False):
    """Single-layer GIN forward (n_layers=1, dropout=0, return_edge_code=False)."""
    # TODO(synk): return_edge_code=True references an undefined name in the original
    # PyTorch GIN.forward (upstream bug); only the default path is implemented.
    B, N, _ = x.shape
    node_info = jnp.concatenate([x, node_attr], axis=2).astype(jnp.float32)   # (B, N, D1)
    D1 = node_info.shape[2]
    D3 = edge_attr.shape[3]

    w_ea, w_er, w_es, b_e, wn_node, wn_edge, b_n = params
    E = w_er.shape[1]
    Dout = wn_node.shape[1]

    edge_dt = jnp.bfloat16 if edge_in_bf16 else jnp.float32
    # Senders on lanes: one wrapper-side transpose so every in-kernel slab is
    # lane-dense and the D3-minor lane-padding VMEM blow-up disappears.
    ea_t = jnp.transpose(edge_attr.astype(edge_dt), (0, 3, 1, 2))     # (B, D3, Nr, Ns)
    adj_t = adj.astype(edge_dt)                                       # (B, Nr, Ns)
    node_info_t = jnp.transpose(node_info, (0, 2, 1))                 # (B, D1, N)

    w_ea_t = jnp.asarray(w_ea, jnp.float32).T                         # (E, D3)
    w_er_ = jnp.asarray(w_er, jnp.float32)                            # (D1, E)
    w_es_t = jnp.asarray(w_es, jnp.float32).T                         # (E, D1)
    b_e_ = jnp.asarray(b_e, jnp.float32).reshape(1, E)
    wn_node_ = jnp.asarray(wn_node, jnp.float32)                      # (D1, Dout)
    wn_edge_ = jnp.asarray(wn_edge, jnp.float32)                      # (E, Dout)
    b_n_ = jnp.asarray(b_n, jnp.float32).reshape(1, Dout)

    vmem_limit = _vmem_limit_bytes()
    TI, TJ = _choose_tiles(B, N, D1, D3, Dout,
                           edge_itemsize=ea_t.dtype.itemsize,
                           budget=vmem_limit // 2)
    grid = (B, N // TI, N // TJ)

    resident = lambda arr: pl.BlockSpec(arr.shape, lambda b, i, j: (0,) * arr.ndim)

    out = pl.pallas_call(
        gin_layer_kernel,
        out_shape=jax.ShapeDtypeStruct((B, N, Dout), jnp.float32),
        grid_spec=pltpu.PrefetchScalarGridSpec(
            num_scalar_prefetch=0,
            grid=grid,
            in_specs=[
                pl.BlockSpec((1, TI, D1), lambda b, i, j: (b, i, 0)),        # receiver node_info
                pl.BlockSpec((1, D1, TJ), lambda b, i, j: (b, 0, j)),        # sender node_info^T
                pl.BlockSpec((1, D3, TI, TJ), lambda b, i, j: (b, 0, i, j)),  # edge_attr (D3-major)
                pl.BlockSpec((1, TI, TJ), lambda b, i, j: (b, i, j)),        # adjacency
                resident(w_ea_t), resident(w_er_), resident(w_es_t), resident(b_e_),
                resident(wn_node_), resident(wn_edge_), resident(b_n_),
            ],
            out_specs=pl.BlockSpec((1, TI, Dout), lambda b, i, j: (b, i, 0)),
            scratch_shapes=[pltpu.VMEM((TI, E), jnp.float32)],
        ),
        compiler_params=pltpu.CompilerParams(
            dimension_semantics=("parallel", "parallel", "arbitrary"),
            vmem_limit_bytes=vmem_limit),
    )(node_info, node_info_t, ea_t, adj_t,
      w_ea_t, w_er_, w_es_t, b_e_, wn_node_, wn_edge_, b_n_)

    return out


def init_params(key, n_node_attr, n_node_code, n_edge_attr, n_edge_code):
    """Deterministic init mimicking torch.nn.Linear (U(-1/sqrt(fan_in), +1/sqrt(fan_in)))."""
    D1 = n_node_attr + n_node_code          # n_node_info
    D3 = n_edge_attr
    E = n_edge_code
    Dout = D1 - 4

    k = jax.random.split(key, 4)

    # edge_processor: Linear(D3 + 2*D1 -> E); torch weight shape (E, D3+2*D1).
    fan_in_e = D3 + 2 * D1
    bound_e = 1.0 / jnp.sqrt(fan_in_e)
    w_e = jax.random.uniform(k[0], (E, fan_in_e), jnp.float32, -bound_e, bound_e)
    b_e = jax.random.uniform(k[1], (1, E), jnp.float32, -bound_e, bound_e)
    w_ea = w_e[:, :D3].T                     # (D3, E)
    w_er = w_e[:, D3:D3 + D1].T              # (D1, E)
    w_es = w_e[:, D3 + D1:].T                # (D1, E)

    # node_processor: Linear(D1 + E -> Dout); torch weight shape (Dout, D1+E).
    fan_in_n = D1 + E
    bound_n = 1.0 / jnp.sqrt(fan_in_n)
    w_n = jax.random.uniform(k[2], (Dout, fan_in_n), jnp.float32, -bound_n, bound_n)
    b_n = jax.random.uniform(k[3], (1, Dout), jnp.float32, -bound_n, bound_n)
    wn_node = w_n[:, :D1].T                  # (D1, Dout)
    wn_edge = w_n[:, D1:].T                  # (E, Dout)

    return (w_ea, w_er, w_es, b_e, wn_node, wn_edge, b_n)


def gin_reference(x, node_attr, edge_attr, adj, params):
    """Pure-JAX reference matching the PyTorch forward semantics."""
    w_ea, w_er, w_es, b_e, wn_node, wn_edge, b_n = params
    node_info = jnp.concatenate([x, node_attr], axis=2)                 # B,N,D1
    pre = (jnp.einsum('bijd,de->bije', edge_attr, w_ea)
           + jnp.einsum('bid,de->bie', node_info, w_er)[:, :, None, :]
           + jnp.einsum('bjd,de->bje', node_info, w_es)[:, None, :, :]
           + b_e[None, None])
    edge_code = jnp.where(pre > 0, pre, NEG_SLOPE * pre)
    edge_agg = jnp.sum(edge_code * adj[:, :, :, None], axis=2)          # B,N,E
    new_node = (jnp.einsum('bnd,do->bno', node_info, wn_node)
                + jnp.einsum('bne,eo->bno', edge_agg, wn_edge)
                + b_n[None])
    return jnp.where(new_node > 0, new_node, NEG_SLOPE * new_node)


if __name__ == "__main__":
    # Small shapes consistent with the module (n_layers=1, dropout=0).
    B, N = 2, 8
    n_node_attr, n_node_code = 6, 10      # n_node_info = 16
    n_edge_attr, n_edge_code = 4, 8       # output dim   = 12

    key = jax.random.PRNGKey(0)
    kx, ka, ke, kadj, kp = jax.random.split(key, 5)

    x = jax.random.normal(kx, (B, N, n_node_code), jnp.float32)
    node_attr = jax.random.normal(ka, (B, N, n_node_attr), jnp.float32)
    edge_attr = jax.random.normal(ke, (B, N, N, n_edge_attr), jnp.float32)
    adj = (jax.random.uniform(kadj, (B, N, N)) > 0.5).astype(jnp.float32)

    params = init_params(kp, n_node_attr, n_node_code, n_edge_attr, n_edge_code)

    out = gin_forward(x, node_attr, edge_attr, adj, params)
    out = jax.block_until_ready(out)

    ref = jax.block_until_ready(gin_reference(x, node_attr, edge_attr, adj, params))
    assert out.shape == (B, N, n_node_attr + n_node_code - 4)
    assert jnp.allclose(out, ref, atol=1e-5, rtol=1e-5), "mismatch vs. reference"

    print("KERNEL_OK")
</pallas_src>

<mosaic_0001>
module attributes {stable_mosaic.version = 11 : i64} {
  func.func @gin_layer_kernel(%arg0: i32, %arg1: i32, %arg2: i32, %arg3: memref<1x8x16xf32, #tpu.memory_space<vmem>>, %arg4: memref<1x16x8xf32, #tpu.memory_space<vmem>>, %arg5: memref<1x4x8x8xf32, #tpu.memory_space<vmem>>, %arg6: memref<1x8x8xf32, #tpu.memory_space<vmem>>, %arg7: memref<8x4xf32, #tpu.memory_space<vmem>>, %arg8: memref<16x8xf32, #tpu.memory_space<vmem>>, %arg9: memref<8x16xf32, #tpu.memory_space<vmem>>, %arg10: memref<1x8xf32, #tpu.memory_space<vmem>>, %arg11: memref<16x12xf32, #tpu.memory_space<vmem>>, %arg12: memref<8x12xf32, #tpu.memory_space<vmem>>, %arg13: memref<1x12xf32, #tpu.memory_space<vmem>>, %arg14: memref<1x8x12xf32, #tpu.memory_space<vmem>>, %arg15: memref<8x8xf32, #tpu.memory_space<vmem>>) attributes {dimension_semantics = [#tpu.dimension_semantics<parallel>, #tpu.dimension_semantics<parallel>, #tpu.dimension_semantics<arbitrary>], iteration_bounds = array<i64: 2, 1, 1>, scalar_prefetch = 0 : i64, scratch_operands = 1 : i64, tpu.core_type = #tpu.core_type<tc>, window_params = [{transform_indices = @transform_0, window_bounds = array<i64: 1, 8, 16>}, {transform_indices = @transform_1, window_bounds = array<i64: 1, 16, 8>}, {transform_indices = @transform_2, window_bounds = array<i64: 1, 4, 8, 8>}, {transform_indices = @transform_3, window_bounds = array<i64: 1, 8, 8>}, {pipeline_mode = #tpu.pipeline_mode<synchronous>, transform_indices = @transform_4, window_bounds = array<i64: 8, 4>}, {pipeline_mode = #tpu.pipeline_mode<synchronous>, transform_indices = @transform_5, window_bounds = array<i64: 16, 8>}, {pipeline_mode = #tpu.pipeline_mode<synchronous>, transform_indices = @transform_6, window_bounds = array<i64: 8, 16>}, {pipeline_mode = #tpu.pipeline_mode<synchronous>, transform_indices = @transform_7, window_bounds = array<i64: 1, 8>}, {pipeline_mode = #tpu.pipeline_mode<synchronous>, transform_indices = @transform_8, window_bounds = array<i64: 16, 12>}, {pipeline_mode = #tpu.pipeline_mode<synchronous>, transform_indices = @transform_9, window_bounds = array<i64: 8, 12>}, {pipeline_mode = #tpu.pipeline_mode<synchronous>, transform_indices = @transform_10, window_bounds = array<i64: 1, 12>}, {transform_indices = @transform_11, window_bounds = array<i64: 1, 8, 12>}]} {
    %c0_i32 = arith.constant 0 : i32
    %0 = arith.cmpi eq, %arg2, %c0_i32 : i32
    %1 = arith.extui %0 : i1 to i32
    %c0_i32_0 = arith.constant 0 : i32
    %2 = arith.cmpi ne, %1, %c0_i32_0 : i32
    scf.if %2 {
      %cst_52 = arith.constant 0.000000e+00 : f32
      %322 = vector.broadcast %cst_52 : f32 to vector<8x8xf32>
      %c0_53 = arith.constant 0 : index
      %c0_54 = arith.constant 0 : index
      %323 = vector.load %arg15[%c0_53, %c0_54] : memref<8x8xf32, #tpu.memory_space<vmem>>, vector<8x8xf32>
      tpu.vector_store %arg15[%c0_53, %c0_54], %322 {strides = array<i32>} : memref<8x8xf32, #tpu.memory_space<vmem>>, vector<8x8xf32>,
    } else {
    }
    %c0 = arith.constant 0 : index
    %c0_1 = arith.constant 0 : index
    %c0_2 = arith.constant 0 : index
    %3 = vector.load %arg3[%c0, %c0_1, %c0_2] : memref<1x8x16xf32, #tpu.memory_space<vmem>>, vector<1x8x16xf32>
    %4 = vector.shape_cast %3 : vector<1x8x16xf32> to vector<8x16xf32>
    %c0_3 = arith.constant 0 : index
    %c0_4 = arith.constant 0 : index
    %c0_5 = arith.constant 0 : index
    %5 = vector.load %arg4[%c0_3, %c0_4, %c0_5] : memref<1x16x8xf32, #tpu.memory_space<vmem>>, vector<1x16x8xf32>
    %6 = vector.shape_cast %5 : vector<1x16x8xf32> to vector<16x8xf32>
    %c0_6 = arith.constant 0 : index
    %c0_7 = arith.constant 0 : index
    %c0_8 = arith.constant 0 : index
    %7 = vector.load %arg6[%c0_6, %c0_7, %c0_8] : memref<1x8x8xf32, #tpu.memory_space<vmem>>, vector<1x8x8xf32>
    %8 = vector.shape_cast %7 : vector<1x8x8xf32> to vector<8x8xf32>
    %c0_9 = arith.constant 0 : index
    %c0_10 = arith.constant 0 : index
    %c0_11 = arith.constant 0 : index
    %c0_12 = arith.constant 0 : index
    %9 = vector.load %arg5[%c0_9, %c0_10, %c0_11, %c0_12] : memref<1x4x8x8xf32, #tpu.memory_space<vmem>>, vector<1x4x8x8xf32>
    %10 = vector.shape_cast %9 : vector<1x4x8x8xf32> to vector<4x8x8xf32>
    %c0_13 = arith.constant 0 : index
    %c0_14 = arith.constant 0 : index
    %11 = vector.load %arg7[%c0_13, %c0_14] : memref<8x4xf32, #tpu.memory_space<vmem>>, vector<8x4xf32>
    %c0_15 = arith.constant 0 : index
    %c0_16 = arith.constant 0 : index
    %12 = vector.load %arg8[%c0_15, %c0_16] : memref<16x8xf32, #tpu.memory_space<vmem>>, vector<16x8xf32>
    %cst = arith.constant dense<0.000000e+00> : vector<8x8xf32>
    %13 = tpu.matmul %4, %12, %cst {dimension_numbers = #tpu.dot_dimension_numbers<[1], [0], [0], [1], [0, 0, 1, 1], [], []>} : vector<8x16xf32>, vector<16x8xf32>, vector<8x8xf32> -> vector<8x8xf32>
    %c0_17 = arith.constant 0 : index
    %c0_18 = arith.constant 0 : index
    %14 = vector.load %arg10[%c0_17, %c0_18] : memref<1x8xf32, #tpu.memory_space<vmem>>, vector<1x8xf32>
    %15 = vector.broadcast %14 : vector<1x8xf32> to vector<8x8xf32>
    %16 = arith.addf %13, %15 : vector<8x8xf32>
    %c0_19 = arith.constant 0 : index
    %c0_20 = arith.constant 0 : index
    %17 = vector.load %arg9[%c0_19, %c0_20] : memref<8x16xf32, #tpu.memory_space<vmem>>, vector<8x16xf32>
    %cst_21 = arith.constant dense<0.000000e+00> : vector<8x8xf32>
    %18 = tpu.matmul %17, %6, %cst_21 {dimension_numbers = #tpu.dot_dimension_numbers<[1], [0], [0], [1], [0, 0, 1, 1], [], []>} : vector<8x16xf32>, vector<16x8xf32>, vector<8x8xf32> -> vector<8x8xf32>
    %19 = vector.extract_strided_slice %16 {offsets = [0, 0], sizes = [8, 1], strides = [1, 1]} : vector<8x8xf32> to vector<8x1xf32>
    %20 = vector.extract_strided_slice %18 {offsets = [0, 0], sizes = [1, 8], strides = [1, 1]} : vector<8x8xf32> to vector<1x8xf32>
    %21 = vector.broadcast %19 : vector<8x1xf32> to vector<8x8xf32>
    %22 = vector.broadcast %20 : vector<1x8xf32> to vector<8x8xf32>
    %23 = arith.addf %21, %22 : vector<8x8xf32>
    %24 = vector.extract_strided_slice %11 {offsets = [0, 0], sizes = [1, 1], strides = [1, 1]} : vector<8x4xf32> to vector<1x1xf32>
    %25 = vector.extract_strided_slice %10 {offsets = [0, 0, 0], sizes = [1, 8, 8], strides = [1, 1, 1]} : vector<4x8x8xf32> to vector<1x8x8xf32>
    %26 = vector.shape_cast %25 : vector<1x8x8xf32> to vector<8x8xf32>
    %27 = vector.broadcast %24 : vector<1x1xf32> to vector<8x8xf32>
    %28 = arith.mulf %27, %26 : vector<8x8xf32>
    %29 = arith.addf %23, %28 : vector<8x8xf32>
    %30 = vector.extract_strided_slice %11 {offsets = [0, 1], sizes = [1, 1], strides = [1, 1]} : vector<8x4xf32> to vector<1x1xf32>
    %31 = vector.extract_strided_slice %10 {offsets = [1, 0, 0], sizes = [1, 8, 8], strides = [1, 1, 1]} : vector<4x8x8xf32> to vector<1x8x8xf32>
    %32 = vector.shape_cast %31 : vector<1x8x8xf32> to vector<8x8xf32>
    %33 = vector.broadcast %30 : vector<1x1xf32> to vector<8x8xf32>
    %34 = arith.mulf %33, %32 : vector<8x8xf32>
    %35 = arith.addf %29, %34 : vector<8x8xf32>
    %36 = vector.extract_strided_slice %11 {offsets = [0, 2], sizes = [1, 1], strides = [1, 1]} : vector<8x4xf32> to vector<1x1xf32>
    %37 = vector.extract_strided_slice %10 {offsets = [2, 0, 0], sizes = [1, 8, 8], strides = [1, 1, 1]} : vector<4x8x8xf32> to vector<1x8x8xf32>
    %38 = vector.shape_cast %37 : vector<1x8x8xf32> to vector<8x8xf32>
    %39 = vector.broadcast %36 : vector<1x1xf32> to vector<8x8xf32>
    %40 = arith.mulf %39, %38 : vector<8x8xf32>
    %41 = arith.addf %35, %40 : vector<8x8xf32>
    %42 = vector.extract_strided_slice %11 {offsets = [0, 3], sizes = [1, 1], strides = [1, 1]} : vector<8x4xf32> to vector<1x1xf32>
    %43 = vector.extract_strided_slice %10 {offsets = [3, 0, 0], sizes = [1, 8, 8], strides = [1, 1, 1]} : vector<4x8x8xf32> to vector<1x8x8xf32>
    %44 = vector.shape_cast %43 : vector<1x8x8xf32> to vector<8x8xf32>
    %45 = vector.broadcast %42 : vector<1x1xf32> to vector<8x8xf32>
    %46 = arith.mulf %45, %44 : vector<8x8xf32>
    %47 = arith.addf %41, %46 : vector<8x8xf32>
    %cst_22 = arith.constant 0.000000e+00 : f32
    %48 = vector.broadcast %cst_22 : f32 to vector<8x8xf32>
    %49 = arith.cmpf ogt, %47, %48 : vector<8x8xf32>
    %cst_23 = arith.constant 0.00999999977 : f32
    %50 = vector.broadcast %cst_23 : f32 to vector<8x8xf32>
    %51 = arith.mulf %50, %47 : vector<8x8xf32>
    %52 = arith.select %49, %47, %51 : vector<8x8xi1>, vector<8x8xf32>
    %53 = arith.mulf %52, %8 : vector<8x8xf32>
    %cst_24 = arith.constant dense<0.000000e+00> : vector<8xf32>
    %54 = vector.multi_reduction <add>, %53, %cst_24 [1] : vector<8x8xf32> to vector<8xf32>
    %55 = vector.shape_cast %54 : vector<8xf32> to vector<8x1xf32>
    %56 = vector.extract_strided_slice %16 {offsets = [0, 1], sizes = [8, 1], strides = [1, 1]} : vector<8x8xf32> to vector<8x1xf32>
    %57 = vector.extract_strided_slice %18 {offsets = [1, 0], sizes = [1, 8], strides = [1, 1]} : vector<8x8xf32> to vector<1x8xf32>
    %58 = vector.broadcast %56 : vector<8x1xf32> to vector<8x8xf32>
    %59 = vector.broadcast %57 : vector<1x8xf32> to vector<8x8xf32>
    %60 = arith.addf %58, %59 : vector<8x8xf32>
    %61 = vector.extract_strided_slice %11 {offsets = [1, 0], sizes = [1, 1], strides = [1, 1]} : vector<8x4xf32> to vector<1x1xf32>
    %62 = vector.extract_strided_slice %10 {offsets = [0, 0, 0], sizes = [1, 8, 8], strides = [1, 1, 1]} : vector<4x8x8xf32> to vector<1x8x8xf32>
    %63 = vector.shape_cast %62 : vector<1x8x8xf32> to vector<8x8xf32>
    %64 = vector.broadcast %61 : vector<1x1xf32> to vector<8x8xf32>
    %65 = arith.mulf %64, %63 : vector<8x8xf32>
    %66 = arith.addf %60, %65 : vector<8x8xf32>
    %67 = vector.extract_strided_slice %11 {offsets = [1, 1], sizes = [1, 1], strides = [1, 1]} : vector<8x4xf32> to vector<1x1xf32>
    %68 = vector.extract_strided_slice %10 {offsets = [1, 0, 0], sizes = [1, 8, 8], strides = [1, 1, 1]} : vector<4x8x8xf32> to vector<1x8x8xf32>
    %69 = vector.shape_cast %68 : vector<1x8x8xf32> to vector<8x8xf32>
    %70 = vector.broadcast %67 : vector<1x1xf32> to vector<8x8xf32>
    %71 = arith.mulf %70, %69 : vector<8x8xf32>
    %72 = arith.addf %66, %71 : vector<8x8xf32>
    %73 = vector.extract_strided_slice %11 {offsets = [1, 2], sizes = [1, 1], strides = [1, 1]} : vector<8x4xf32> to vector<1x1xf32>
    %74 = vector.extract_strided_slice %10 {offsets = [2, 0, 0], sizes = [1, 8, 8], strides = [1, 1, 1]} : vector<4x8x8xf32> to vector<1x8x8xf32>
    %75 = vector.shape_cast %74 : vector<1x8x8xf32> to vector<8x8xf32>
    %76 = vector.broadcast %73 : vector<1x1xf32> to vector<8x8xf32>
    %77 = arith.mulf %76, %75 : vector<8x8xf32>
    %78 = arith.addf %72, %77 : vector<8x8xf32>
    %79 = vector.extract_strided_slice %11 {offsets = [1, 3], sizes = [1, 1], strides = [1, 1]} : vector<8x4xf32> to vector<1x1xf32>
    %80 = vector.extract_strided_slice %10 {offsets = [3, 0, 0], sizes = [1, 8, 8], strides = [1, 1, 1]} : vector<4x8x8xf32> to vector<1x8x8xf32>
    %81 = vector.shape_cast %80 : vector<1x8x8xf32> to vector<8x8xf32>
    %82 = vector.broadcast %79 : vector<1x1xf32> to vector<8x8xf32>
    %83 = arith.mulf %82, %81 : vector<8x8xf32>
    %84 = arith.addf %78, %83 : vector<8x8xf32>
    %cst_25 = arith.constant 0.000000e+00 : f32
    %85 = vector.broadcast %cst_25 : f32 to vector<8x8xf32>
    %86 = arith.cmpf ogt, %84, %85 : vector<8x8xf32>
    %cst_26 = arith.constant 0.00999999977 : f32
    %87 = vector.broadcast %cst_26 : f32 to vector<8x8xf32>
    %88 = arith.mulf %87, %84 : vector<8x8xf32>
    %89 = arith.select %86, %84, %88 : vector<8x8xi1>, vector<8x8xf32>
    %90 = arith.mulf %89, %8 : vector<8x8xf32>
    %cst_27 = arith.constant dense<0.000000e+00> : vector<8xf32>
    %91 = vector.multi_reduction <add>, %90, %cst_27 [1] : vector<8x8xf32> to vector<8xf32>
    %92 = vector.shape_cast %91 : vector<8xf32> to vector<8x1xf32>
    %93 = vector.extract_strided_slice %16 {offsets = [0, 2], sizes = [8, 1], strides = [1, 1]} : vector<8x8xf32> to vector<8x1xf32>
    %94 = vector.extract_strided_slice %18 {offsets = [2, 0], sizes = [1, 8], strides = [1, 1]} : vector<8x8xf32> to vector<1x8xf32>
    %95 = vector.broadcast %93 : vector<8x1xf32> to vector<8x8xf32>
    %96 = vector.broadcast %94 : vector<1x8xf32> to vector<8x8xf32>
    %97 = arith.addf %95, %96 : vector<8x8xf32>
    %98 = vector.extract_strided_slice %11 {offsets = [2, 0], sizes = [1, 1], strides = [1, 1]} : vector<8x4xf32> to vector<1x1xf32>
    %99 = vector.extract_strided_slice %10 {offsets = [0, 0, 0], sizes = [1, 8, 8], strides = [1, 1, 1]} : vector<4x8x8xf32> to vector<1x8x8xf32>
    %100 = vector.shape_cast %99 : vector<1x8x8xf32> to vector<8x8xf32>
    %101 = vector.broadcast %98 : vector<1x1xf32> to vector<8x8xf32>
    %102 = arith.mulf %101, %100 : vector<8x8xf32>
    %103 = arith.addf %97, %102 : vector<8x8xf32>
    %104 = vector.extract_strided_slice %11 {offsets = [2, 1], sizes = [1, 1], strides = [1, 1]} : vector<8x4xf32> to vector<1x1xf32>
    %105 = vector.extract_strided_slice %10 {offsets = [1, 0, 0], sizes = [1, 8, 8], strides = [1, 1, 1]} : vector<4x8x8xf32> to vector<1x8x8xf32>
    %106 = vector.shape_cast %105 : vector<1x8x8xf32> to vector<8x8xf32>
    %107 = vector.broadcast %104 : vector<1x1xf32> to vector<8x8xf32>
    %108 = arith.mulf %107, %106 : vector<8x8xf32>
    %109 = arith.addf %103, %108 : vector<8x8xf32>
    %110 = vector.extract_strided_slice %11 {offsets = [2, 2], sizes = [1, 1], strides = [1, 1]} : vector<8x4xf32> to vector<1x1xf32>
    %111 = vector.extract_strided_slice %10 {offsets = [2, 0, 0], sizes = [1, 8, 8], strides = [1, 1, 1]} : vector<4x8x8xf32> to vector<1x8x8xf32>
    %112 = vector.shape_cast %111 : vector<1x8x8xf32> to vector<8x8xf32>
    %113 = vector.broadcast %110 : vector<1x1xf32> to vector<8x8xf32>
    %114 = arith.mulf %113, %112 : vector<8x8xf32>
    %115 = arith.addf %109, %114 : vector<8x8xf32>
    %116 = vector.extract_strided_slice %11 {offsets = [2, 3], sizes = [1, 1], strides = [1, 1]} : vector<8x4xf32> to vector<1x1xf32>
    %117 = vector.extract_strided_slice %10 {offsets = [3, 0, 0], sizes = [1, 8, 8], strides = [1, 1, 1]} : vector<4x8x8xf32> to vector<1x8x8xf32>
    %118 = vector.shape_cast %117 : vector<1x8x8xf32> to vector<8x8xf32>
    %119 = vector.broadcast %116 : vector<1x1xf32> to vector<8x8xf32>
    %120 = arith.mulf %119, %118 : vector<8x8xf32>
    %121 = arith.addf %115, %120 : vector<8x8xf32>
    %cst_28 = arith.constant 0.000000e+00 : f32
    %122 = vector.broadcast %cst_28 : f32 to vector<8x8xf32>
    %123 = arith.cmpf ogt, %121, %122 : vector<8x8xf32>
    %cst_29 = arith.constant 0.00999999977 : f32
    %124 = vector.broadcast %cst_29 : f32 to vector<8x8xf32>
    %125 = arith.mulf %124, %121 : vector<8x8xf32>
    %126 = arith.select %123, %121, %125 : vector<8x8xi1>, vector<8x8xf32>
    %127 = arith.mulf %126, %8 : vector<8x8xf32>
    %cst_30 = arith.constant dense<0.000000e+00> : vector<8xf32>
    %128 = vector.multi_reduction <add>, %127, %cst_30 [1] : vector<8x8xf32> to vector<8xf32>
    %129 = vector.shape_cast %128 : vector<8xf32> to vector<8x1xf32>
    %130 = vector.extract_strided_slice %16 {offsets = [0, 3], sizes = [8, 1], strides = [1, 1]} : vector<8x8xf32> to vector<8x1xf32>
    %131 = vector.extract_strided_slice %18 {offsets = [3, 0], sizes = [1, 8], strides = [1, 1]} : vector<8x8xf32> to vector<1x8xf32>
    %132 = vector.broadcast %130 : vector<8x1xf32> to vector<8x8xf32>
    %133 = vector.broadcast %131 : vector<1x8xf32> to vector<8x8xf32>
    %134 = arith.addf %132, %133 : vector<8x8xf32>
    %135 = vector.extract_strided_slice %11 {offsets = [3, 0], sizes = [1, 1], strides = [1, 1]} : vector<8x4xf32> to vector<1x1xf32>
    %136 = vector.extract_strided_slice %10 {offsets = [0, 0, 0], sizes = [1, 8, 8], strides = [1, 1, 1]} : vector<4x8x8xf32> to vector<1x8x8xf32>
    %137 = vector.shape_cast %136 : vector<1x8x8xf32> to vector<8x8xf32>
    %138 = vector.broadcast %135 : vector<1x1xf32> to vector<8x8xf32>
    %139 = arith.mulf %138, %137 : vector<8x8xf32>
    %140 = arith.addf %134, %139 : vector<8x8xf32>
    %141 = vector.extract_strided_slice %11 {offsets = [3, 1], sizes = [1, 1], strides = [1, 1]} : vector<8x4xf32> to vector<1x1xf32>
    %142 = vector.extract_strided_slice %10 {offsets = [1, 0, 0], sizes = [1, 8, 8], strides = [1, 1, 1]} : vector<4x8x8xf32> to vector<1x8x8xf32>
    %143 = vector.shape_cast %142 : vector<1x8x8xf32> to vector<8x8xf32>
    %144 = vector.broadcast %141 : vector<1x1xf32> to vector<8x8xf32>
    %145 = arith.mulf %144, %143 : vector<8x8xf32>
    %146 = arith.addf %140, %145 : vector<8x8xf32>
    %147 = vector.extract_strided_slice %11 {offsets = [3, 2], sizes = [1, 1], strides = [1, 1]} : vector<8x4xf32> to vector<1x1xf32>
    %148 = vector.extract_strided_slice %10 {offsets = [2, 0, 0], sizes = [1, 8, 8], strides = [1, 1, 1]} : vector<4x8x8xf32> to vector<1x8x8xf32>
    %149 = vector.shape_cast %148 : vector<1x8x8xf32> to vector<8x8xf32>
    %150 = vector.broadcast %147 : vector<1x1xf32> to vector<8x8xf32>
    %151 = arith.mulf %150, %149 : vector<8x8xf32>
    %152 = arith.addf %146, %151 : vector<8x8xf32>
    %153 = vector.extract_strided_slice %11 {offsets = [3, 3], sizes = [1, 1], strides = [1, 1]} : vector<8x4xf32> to vector<1x1xf32>
    %154 = vector.extract_strided_slice %10 {offsets = [3, 0, 0], sizes = [1, 8, 8], strides = [1, 1, 1]} : vector<4x8x8xf32> to vector<1x8x8xf32>
    %155 = vector.shape_cast %154 : vector<1x8x8xf32> to vector<8x8xf32>
    %156 = vector.broadcast %153 : vector<1x1xf32> to vector<8x8xf32>
    %157 = arith.mulf %156, %155 : vector<8x8xf32>
    %158 = arith.addf %152, %157 : vector<8x8xf32>
    %cst_31 = arith.constant 0.000000e+00 : f32
    %159 = vector.broadcast %cst_31 : f32 to vector<8x8xf32>
    %160 = arith.cmpf ogt, %158, %159 : vector<8x8xf32>
    %cst_32 = arith.constant 0.00999999977 : f32
    %161 = vector.broadcast %cst_32 : f32 to vector<8x8xf32>
    %162 = arith.mulf %161, %158 : vector<8x8xf32>
    %163 = arith.select %160, %158, %162 : vector<8x8xi1>, vector<8x8xf32>
    %164 = arith.mulf %163, %8 : vector<8x8xf32>
    %cst_33 = arith.constant dense<0.000000e+00> : vector<8xf32>
    %165 = vector.multi_reduction <add>, %164, %cst_33 [1] : vector<8x8xf32> to vector<8xf32>
    %166 = vector.shape_cast %165 : vector<8xf32> to vector<8x1xf32>
    %167 = vector.extract_strided_slice %16 {offsets = [0, 4], sizes = [8, 1], strides = [1, 1]} : vector<8x8xf32> to vector<8x1xf32>
    %168 = vector.extract_strided_slice %18 {offsets = [4, 0], sizes = [1, 8], strides = [1, 1]} : vector<8x8xf32> to vector<1x8xf32>
    %169 = vector.broadcast %167 : vector<8x1xf32> to vector<8x8xf32>
    %170 = vector.broadcast %168 : vector<1x8xf32> to vector<8x8xf32>
    %171 = arith.addf %169, %170 : vector<8x8xf32>
    %172 = vector.extract_strided_slice %11 {offsets = [4, 0], sizes = [1, 1], strides = [1, 1]} : vector<8x4xf32> to vector<1x1xf32>
    %173 = vector.extract_strided_slice %10 {offsets = [0, 0, 0], sizes = [1, 8, 8], strides = [1, 1, 1]} : vector<4x8x8xf32> to vector<1x8x8xf32>
    %174 = vector.shape_cast %173 : vector<1x8x8xf32> to vector<8x8xf32>
    %175 = vector.broadcast %172 : vector<1x1xf32> to vector<8x8xf32>
    %176 = arith.mulf %175, %174 : vector<8x8xf32>
    %177 = arith.addf %171, %176 : vector<8x8xf32>
    %178 = vector.extract_strided_slice %11 {offsets = [4, 1], sizes = [1, 1], strides = [1, 1]} : vector<8x4xf32> to vector<1x1xf32>
    %179 = vector.extract_strided_slice %10 {offsets = [1, 0, 0], sizes = [1, 8, 8], strides = [1, 1, 1]} : vector<4x8x8xf32> to vector<1x8x8xf32>
    %180 = vector.shape_cast %179 : vector<1x8x8xf32> to vector<8x8xf32>
    %181 = vector.broadcast %178 : vector<1x1xf32> to vector<8x8xf32>
    %182 = arith.mulf %181, %180 : vector<8x8xf32>
    %183 = arith.addf %177, %182 : vector<8x8xf32>
    %184 = vector.extract_strided_slice %11 {offsets = [4, 2], sizes = [1, 1], strides = [1, 1]} : vector<8x4xf32> to vector<1x1xf32>
    %185 = vector.extract_strided_slice %10 {offsets = [2, 0, 0], sizes = [1, 8, 8], strides = [1, 1, 1]} : vector<4x8x8xf32> to vector<1x8x8xf32>
    %186 = vector.shape_cast %185 : vector<1x8x8xf32> to vector<8x8xf32>
    %187 = vector.broadcast %184 : vector<1x1xf32> to vector<8x8xf32>
    %188 = arith.mulf %187, %186 : vector<8x8xf32>
    %189 = arith.addf %183, %188 : vector<8x8xf32>
    %190 = vector.extract_strided_slice %11 {offsets = [4, 3], sizes = [1, 1], strides = [1, 1]} : vector<8x4xf32> to vector<1x1xf32>
    %191 = vector.extract_strided_slice %10 {offsets = [3, 0, 0], sizes = [1, 8, 8], strides = [1, 1, 1]} : vector<4x8x8xf32> to vector<1x8x8xf32>
    %192 = vector.shape_cast %191 : vector<1x8x8xf32> to vector<8x8xf32>
    %193 = vector.broadcast %190 : vector<1x1xf32> to vector<8x8xf32>
    %194 = arith.mulf %193, %192 : vector<8x8xf32>
    %195 = arith.addf %189, %194 : vector<8x8xf32>
    %cst_34 = arith.constant 0.000000e+00 : f32
    %196 = vector.broadcast %cst_34 : f32 to vector<8x8xf32>
    %197 = arith.cmpf ogt, %195, %196 : vector<8x8xf32>
    %cst_35 = arith.constant 0.00999999977 : f32
    %198 = vector.broadcast %cst_35 : f32 to vector<8x8xf32>
    %199 = arith.mulf %198, %195 : vector<8x8xf32>
    %200 = arith.select %197, %195, %199 : vector<8x8xi1>, vector<8x8xf32>
    %201 = arith.mulf %200, %8 : vector<8x8xf32>
    %cst_36 = arith.constant dense<0.000000e+00> : vector<8xf32>
    %202 = vector.multi_reduction <add>, %201, %cst_36 [1] : vector<8x8xf32> to vector<8xf32>
    %203 = vector.shape_cast %202 : vector<8xf32> to vector<8x1xf32>
    %204 = vector.extract_strided_slice %16 {offsets = [0, 5], sizes = [8, 1], strides = [1, 1]} : vector<8x8xf32> to vector<8x1xf32>
    %205 = vector.extract_strided_slice %18 {offsets = [5, 0], sizes = [1, 8], strides = [1, 1]} : vector<8x8xf32> to vector<1x8xf32>
    %206 = vector.broadcast %204 : vector<8x1xf32> to vector<8x8xf32>
    %207 = vector.broadcast %205 : vector<1x8xf32> to vector<8x8xf32>
    %208 = arith.addf %206, %207 : vector<8x8xf32>
    %209 = vector.extract_strided_slice %11 {offsets = [5, 0], sizes = [1, 1], strides = [1, 1]} : vector<8x4xf32> to vector<1x1xf32>
    %210 = vector.extract_strided_slice %10 {offsets = [0, 0, 0], sizes = [1, 8, 8], strides = [1, 1, 1]} : vector<4x8x8xf32> to vector<1x8x8xf32>
    %211 = vector.shape_cast %210 : vector<1x8x8xf32> to vector<8x8xf32>
    %212 = vector.broadcast %209 : vector<1x1xf32> to vector<8x8xf32>
    %213 = arith.mulf %212, %211 : vector<8x8xf32>
    %214 = arith.addf %208, %213 : vector<8x8xf32>
    %215 = vector.extract_strided_slice %11 {offsets = [5, 1], sizes = [1, 1], strides = [1, 1]} : vector<8x4xf32> to vector<1x1xf32>
    %216 = vector.extract_strided_slice %10 {offsets = [1, 0, 0], sizes = [1, 8, 8], strides = [1, 1, 1]} : vector<4x8x8xf32> to vector<1x8x8xf32>
    %217 = vector.shape_cast %216 : vector<1x8x8xf32> to vector<8x8xf32>
    %218 = vector.broadcast %215 : vector<1x1xf32> to vector<8x8xf32>
    %219 = arith.mulf %218, %217 : vector<8x8xf32>
    %220 = arith.addf %214, %219 : vector<8x8xf32>
    %221 = vector.extract_strided_slice %11 {offsets = [5, 2], sizes = [1, 1], strides = [1, 1]} : vector<8x4xf32> to vector<1x1xf32>
    %222 = vector.extract_strided_slice %10 {offsets = [2, 0, 0], sizes = [1, 8, 8], strides = [1, 1, 1]} : vector<4x8x8xf32> to vector<1x8x8xf32>
    %223 = vector.shape_cast %222 : vector<1x8x8xf32> to vector<8x8xf32>
    %224 = vector.broadcast %221 : vector<1x1xf32> to vector<8x8xf32>
    %225 = arith.mulf %224, %223 : vector<8x8xf32>
    %226 = arith.addf %220, %225 : vector<8x8xf32>
    %227 = vector.extract_strided_slice %11 {offsets = [5, 3], sizes = [1, 1], strides = [1, 1]} : vector<8x4xf32> to vector<1x1xf32>
    %228 = vector.extract_strided_slice %10 {offsets = [3, 0, 0], sizes = [1, 8, 8], strides = [1, 1, 1]} : vector<4x8x8xf32> to vector<1x8x8xf32>
    %229 = vector.shape_cast %228 : vector<1x8x8xf32> to vector<8x8xf32>
    %230 = vector.broadcast %227 : vector<1x1xf32> to vector<8x8xf32>
    %231 = arith.mulf %230, %229 : vector<8x8xf32>
    %232 = arith.addf %226, %231 : vector<8x8xf32>
    %cst_37 = arith.constant 0.000000e+00 : f32
    %233 = vector.broadcast %cst_37 : f32 to vector<8x8xf32>
    %234 = arith.cmpf ogt, %232, %233 : vector<8x8xf32>
    %cst_38 = arith.constant 0.00999999977 : f32
    %235 = vector.broadcast %cst_38 : f32 to vector<8x8xf32>
    %236 = arith.mulf %235, %232 : vector<8x8xf32>
    %237 = arith.select %234, %232, %236 : vector<8x8xi1>, vector<8x8xf32>
    %238 = arith.mulf %237, %8 : vector<8x8xf32>
    %cst_39 = arith.constant dense<0.000000e+00> : vector<8xf32>
    %239 = vector.multi_reduction <add>, %238, %cst_39 [1] : vector<8x8xf32> to vector<8xf32>
    %240 = vector.shape_cast %239 : vector<8xf32> to vector<8x1xf32>
    %241 = vector.extract_strided_slice %16 {offsets = [0, 6], sizes = [8, 1], strides = [1, 1]} : vector<8x8xf32> to vector<8x1xf32>
    %242 = vector.extract_strided_slice %18 {offsets = [6, 0], sizes = [1, 8], strides = [1, 1]} : vector<8x8xf32> to vector<1x8xf32>
    %243 = vector.broadcast %241 : vector<8x1xf32> to vector<8x8xf32>
    %244 = vector.broadcast %242 : vector<1x8xf32> to vector<8x8xf32>
    %245 = arith.addf %243, %244 : vector<8x8xf32>
    %246 = vector.extract_strided_slice %11 {offsets = [6, 0], sizes = [1, 1], strides = [1, 1]} : vector<8x4xf32> to vector<1x1xf32>
    %247 = vector.extract_strided_slice %10 {offsets = [0, 0, 0], sizes = [1, 8, 8], strides = [1, 1, 1]} : vector<4x8x8xf32> to vector<1x8x8xf32>
    %248 = vector.shape_cast %247 : vector<1x8x8xf32> to vector<8x8xf32>
    %249 = vector.broadcast %246 : vector<1x1xf32> to vector<8x8xf32>
    %250 = arith.mulf %249, %248 : vector<8x8xf32>
    %251 = arith.addf %245, %250 : vector<8x8xf32>
    %252 = vector.extract_strided_slice %11 {offsets = [6, 1], sizes = [1, 1], strides = [1, 1]} : vector<8x4xf32> to vector<1x1xf32>
    %253 = vector.extract_strided_slice %10 {offsets = [1, 0, 0], sizes = [1, 8, 8], strides = [1, 1, 1]} : vector<4x8x8xf32> to vector<1x8x8xf32>
    %254 = vector.shape_cast %253 : vector<1x8x8xf32> to vector<8x8xf32>
    %255 = vector.broadcast %252 : vector<1x1xf32> to vector<8x8xf32>
    %256 = arith.mulf %255, %254 : vector<8x8xf32>
    %257 = arith.addf %251, %256 : vector<8x8xf32>
    %258 = vector.extract_strided_slice %11 {offsets = [6, 2], sizes = [1, 1], strides = [1, 1]} : vector<8x4xf32> to vector<1x1xf32>
    %259 = vector.extract_strided_slice %10 {offsets = [2, 0, 0], sizes = [1, 8, 8], strides = [1, 1, 1]} : vector<4x8x8xf32> to vector<1x8x8xf32>
    %260 = vector.shape_cast %259 : vector<1x8x8xf32> to vector<8x8xf32>
    %261 = vector.broadcast %258 : vector<1x1xf32> to vector<8x8xf32>
    %262 = arith.mulf %261, %260 : vector<8x8xf32>
    %263 = arith.addf %257, %262 : vector<8x8xf32>
    %264 = vector.extract_strided_slice %11 {offsets = [6, 3], sizes = [1, 1], strides = [1, 1]} : vector<8x4xf32> to vector<1x1xf32>
    %265 = vector.extract_strided_slice %10 {offsets = [3, 0, 0], sizes = [1, 8, 8], strides = [1, 1, 1]} : vector<4x8x8xf32> to vector<1x8x8xf32>
    %266 = vector.shape_cast %265 : vector<1x8x8xf32> to vector<8x8xf32>
    %267 = vector.broadcast %264 : vector<1x1xf32> to vector<8x8xf32>
    %268 = arith.mulf %267, %266 : vector<8x8xf32>
    %269 = arith.addf %263, %268 : vector<8x8xf32>
    %cst_40 = arith.constant 0.000000e+00 : f32
    %270 = vector.broadcast %cst_40 : f32 to vector<8x8xf32>
    %271 = arith.cmpf ogt, %269, %270 : vector<8x8xf32>
    %cst_41 = arith.constant 0.00999999977 : f32
    %272 = vector.broadcast %cst_41 : f32 to vector<8x8xf32>
    %273 = arith.mulf %272, %269 : vector<8x8xf32>
    %274 = arith.select %271, %269, %273 : vector<8x8xi1>, vector<8x8xf32>
    %275 = arith.mulf %274, %8 : vector<8x8xf32>
    %cst_42 = arith.constant dense<0.000000e+00> : vector<8xf32>
    %276 = vector.multi_reduction <add>, %275, %cst_42 [1] : vector<8x8xf32> to vector<8xf32>
    %277 = vector.shape_cast %276 : vector<8xf32> to vector<8x1xf32>
    %278 = vector.extract_strided_slice %16 {offsets = [0, 7], sizes = [8, 1], strides = [1, 1]} : vector<8x8xf32> to vector<8x1xf32>
    %279 = vector.extract_strided_slice %18 {offsets = [7, 0], sizes = [1, 8], strides = [1, 1]} : vector<8x8xf32> to vector<1x8xf32>
    %280 = vector.broadcast %278 : vector<8x1xf32> to vector<8x8xf32>
    %281 = vector.broadcast %279 : vector<1x8xf32> to vector<8x8xf32>
    %282 = arith.addf %280, %281 : vector<8x8xf32>
    %283 = vector.extract_strided_slice %11 {offsets = [7, 0], sizes = [1, 1], strides = [1, 1]} : vector<8x4xf32> to vector<1x1xf32>
    %284 = vector.extract_strided_slice %10 {offsets = [0, 0, 0], sizes = [1, 8, 8], strides = [1, 1, 1]} : vector<4x8x8xf32> to vector<1x8x8xf32>
    %285 = vector.shape_cast %284 : vector<1x8x8xf32> to vector<8x8xf32>
    %286 = vector.broadcast %283 : vector<1x1xf32> to vector<8x8xf32>
    %287 = arith.mulf %286, %285 : vector<8x8xf32>
    %288 = arith.addf %282, %287 : vector<8x8xf32>
    %289 = vector.extract_strided_slice %11 {offsets = [7, 1], sizes = [1, 1], strides = [1, 1]} : vector<8x4xf32> to vector<1x1xf32>
    %290 = vector.extract_strided_slice %10 {offsets = [1, 0, 0], sizes = [1, 8, 8], strides = [1, 1, 1]} : vector<4x8x8xf32> to vector<1x8x8xf32>
    %291 = vector.shape_cast %290 : vector<1x8x8xf32> to vector<8x8xf32>
    %292 = vector.broadcast %289 : vector<1x1xf32> to vector<8x8xf32>
    %293 = arith.mulf %292, %291 : vector<8x8xf32>
    %294 = arith.addf %288, %293 : vector<8x8xf32>
    %295 = vector.extract_strided_slice %11 {offsets = [7, 2], sizes = [1, 1], strides = [1, 1]} : vector<8x4xf32> to vector<1x1xf32>
    %296 = vector.extract_strided_slice %10 {offsets = [2, 0, 0], sizes = [1, 8, 8], strides = [1, 1, 1]} : vector<4x8x8xf32> to vector<1x8x8xf32>
    %297 = vector.shape_cast %296 : vector<1x8x8xf32> to vector<8x8xf32>
    %298 = vector.broadcast %295 : vector<1x1xf32> to vector<8x8xf32>
    %299 = arith.mulf %298, %297 : vector<8x8xf32>
    %300 = arith.addf %294, %299 : vector<8x8xf32>
    %301 = vector.extract_strided_slice %11 {offsets = [7, 3], sizes = [1, 1], strides = [1, 1]} : vector<8x4xf32> to vector<1x1xf32>
    %302 = vector.extract_strided_slice %10 {offsets = [3, 0, 0], sizes = [1, 8, 8], strides = [1, 1, 1]} : vector<4x8x8xf32> to vector<1x8x8xf32>
    %303 = vector.shape_cast %302 : vector<1x8x8xf32> to vector<8x8xf32>
    %304 = vector.broadcast %301 : vector<1x1xf32> to vector<8x8xf32>
    %305 = arith.mulf %304, %303 : vector<8x8xf32>
    %306 = arith.addf %300, %305 : vector<8x8xf32>
    %cst_43 = arith.constant 0.000000e+00 : f32
    %307 = vector.broadcast %cst_43 : f32 to vector<8x8xf32>
    %308 = arith.cmpf ogt, %306, %307 : vector<8x8xf32>
    %cst_44 = arith.constant 0.00999999977 : f32
    %309 = vector.broadcast %cst_44 : f32 to vector<8x8xf32>
    %310 = arith.mulf %309, %306 : vector<8x8xf32>
    %311 = arith.select %308, %306, %310 : vector<8x8xi1>, vector<8x8xf32>
    %312 = arith.mulf %311, %8 : vector<8x8xf32>
    %cst_45 = arith.constant dense<0.000000e+00> : vector<8xf32>
    %313 = vector.multi_reduction <add>, %312, %cst_45 [1] : vector<8x8xf32> to vector<8xf32>
    %314 = vector.shape_cast %313 : vector<8xf32> to vector<8x1xf32>
    %c0_46 = arith.constant 0 : index
    %c0_47 = arith.constant 0 : index
    %315 = vector.load %arg15[%c0_46, %c0_47] : memref<8x8xf32, #tpu.memory_space<vmem>>, vector<8x8xf32>
    %316 = tpu.concatenate %55, %92, %129, %166, %203, %240, %277, %314 in 1 : vector<8x1xf32>, vector<8x1xf32>, vector<8x1xf32>, vector<8x1xf32>, vector<8x1xf32>, vector<8x1xf32>, vector<8x1xf32>, vector<8x1xf32> -> vector<8x8xf32>
    %317 = arith.addf %315, %316 : vector<8x8xf32>
    %c0_48 = arith.constant 0 : index
    %c0_49 = arith.constant 0 : index
    %318 = vector.load %arg15[%c0_48, %c0_49] : memref<8x8xf32, #tpu.memory_space<vmem>>, vector<8x8xf32>
    tpu.vector_store %arg15[%c0_48, %c0_49], %317 {strides = array<i32>} : memref<8x8xf32, #tpu.memory_space<vmem>>, vector<8x8xf32>,
    %c0_i32_50 = arith.constant 0 : i32
    %319 = arith.cmpi eq, %arg2, %c0_i32_50 : i32
    %320 = arith.extui %319 : i1 to i32
    %c0_i32_51 = arith.constant 0 : i32
    %321 = arith.cmpi ne, %320, %c0_i32_51 : i32
    scf.if %321 {
      %c0_52 = arith.constant 0 : index
      %c0_53 = arith.constant 0 : index
      %322 = vector.load %arg11[%c0_52, %c0_53] : memref<16x12xf32, #tpu.memory_space<vmem>>, vector<16x12xf32>
      %cst_54 = arith.constant dense<0.000000e+00> : vector<8x12xf32>
      %323 = tpu.matmul %4, %322, %cst_54 {dimension_numbers = #tpu.dot_dimension_numbers<[1], [0], [0], [1], [0, 0, 1, 1], [], []>} : vector<8x16xf32>, vector<16x12xf32>, vector<8x12xf32> -> vector<8x12xf32>
      %c0_55 = arith.constant 0 : index
      %c0_56 = arith.constant 0 : index
      %324 = vector.load %arg15[%c0_55, %c0_56] : memref<8x8xf32, #tpu.memory_space<vmem>>, vector<8x8xf32>
      %c0_57 = arith.constant 0 : index
      %c0_58 = arith.constant 0 : index
      %325 = vector.load %arg12[%c0_57, %c0_58] : memref<8x12xf32, #tpu.memory_space<vmem>>, vector<8x12xf32>
      %cst_59 = arith.constant dense<0.000000e+00> : vector<8x12xf32>
      %326 = tpu.matmul %324, %325, %cst_59 {dimension_numbers = #tpu.dot_dimension_numbers<[1], [0], [0], [1], [0, 0, 1, 1], [], []>} : vector<8x8xf32>, vector<8x12xf32>, vector<8x12xf32> -> vector<8x12xf32>
      %327 = arith.addf %323, %326 : vector<8x12xf32>
      %c0_60 = arith.constant 0 : index
      %c0_61 = arith.constant 0 : index
      %328 = vector.load %arg13[%c0_60, %c0_61] : memref<1x12xf32, #tpu.memory_space<vmem>>, vector<1x12xf32>
      %329 = vector.broadcast %328 : vector<1x12xf32> to vector<8x12xf32>
      %330 = arith.addf %327, %329 : vector<8x12xf32>
      %cst_62 = arith.constant 0.000000e+00 : f32
      %331 = vector.broadcast %cst_62 : f32 to vector<8x12xf32>
      %332 = arith.cmpf ogt, %330, %331 : vector<8x12xf32>
      %cst_63 = arith.constant 0.00999999977 : f32
      %333 = vector.broadcast %cst_63 : f32 to vector<8x12xf32>
      %334 = arith.mulf %333, %330 : vector<8x12xf32>
      %335 = arith.select %332, %330, %334 : vector<8x12xi1>, vector<8x12xf32>
      %336 = vector.shape_cast %335 : vector<8x12xf32> to vector<1x8x12xf32>
      %c0_64 = arith.constant 0 : index
      %c0_65 = arith.constant 0 : index
      %c0_66 = arith.constant 0 : index
      %337 = vector.load %arg14[%c0_64, %c0_65, %c0_66] : memref<1x8x12xf32, #tpu.memory_space<vmem>>, vector<1x8x12xf32>
      tpu.vector_store %arg14[%c0_64, %c0_65, %c0_66], %336 {strides = array<i32>} : memref<1x8x12xf32, #tpu.memory_space<vmem>>, vector<1x8x12xf32>,
    } else {
    }
    return
  }
  func.func @transform_0(%arg0: i32, %arg1: i32, %arg2: i32) -> (i32, i32, i32) {
    %c0_i32 = arith.constant 0 : i32
    %c0_i32_0 = arith.constant 0 : i32
    return %arg0, %arg1, %c0_i32 : i32, i32, i32
  }
  func.func @transform_1(%arg0: i32, %arg1: i32, %arg2: i32) -> (i32, i32, i32) {
    %c0_i32 = arith.constant 0 : i32
    %c0_i32_0 = arith.constant 0 : i32
    return %arg0, %c0_i32, %arg2 : i32, i32, i32
  }
  func.func @transform_2(%arg0: i32, %arg1: i32, %arg2: i32) -> (i32, i32, i32, i32) {
    %c0_i32 = arith.constant 0 : i32
    %c0_i32_0 = arith.constant 0 : i32
    return %arg0, %c0_i32, %arg1, %arg2 : i32, i32, i32, i32
  }
  func.func @transform_3(%arg0: i32, %arg1: i32, %arg2: i32) -> (i32, i32, i32) {
    %c0_i32 = arith.constant 0 : i32
    return %arg0, %arg1, %arg2 : i32, i32, i32
  }
  func.func @transform_4(%arg0: i32, %arg1: i32, %arg2: i32) -> (i32, i32) {
    %c0_i32 = arith.constant 0 : i32
    %c0_i32_0 = arith.constant 0 : i32
    %c0_i32_1 = arith.constant 0 : i32
    return %c0_i32, %c0_i32_0 : i32, i32
  }
  func.func @transform_5(%arg0: i32, %arg1: i32, %arg2: i32) -> (i32, i32) {
    %c0_i32 = arith.constant 0 : i32
    %c0_i32_0 = arith.constant 0 : i32
    %c0_i32_1 = arith.constant 0 : i32
    return %c0_i32, %c0_i32_0 : i32, i32
  }
  func.func @transform_6(%arg0: i32, %arg1: i32, %arg2: i32) -> (i32, i32) {
    %c0_i32 = arith.constant 0 : i32
    %c0_i32_0 = arith.constant 0 : i32
    %c0_i32_1 = arith.constant 0 : i32
    return %c0_i32, %c0_i32_0 : i32, i32
  }
  func.func @transform_7(%arg0: i32, %arg1: i32, %arg2: i32) -> (i32, i32) {
    %c0_i32 = arith.constant 0 : i32
    %c0_i32_0 = arith.constant 0 : i32
    %c0_i32_1 = arith.constant 0 : i32
    return %c0_i32, %c0_i32_0 : i32, i32
  }
  func.func @transform_8(%arg0: i32, %arg1: i32, %arg2: i32) -> (i32, i32) {
    %c0_i32 = arith.constant 0 : i32
    %c0_i32_0 = arith.constant 0 : i32
    %c0_i32_1 = arith.constant 0 : i32
    return %c0_i32, %c0_i32_0 : i32, i32
  }
  func.func @transform_9(%arg0: i32, %arg1: i32, %arg2: i32) -> (i32, i32) {
    %c0_i32 = arith.constant 0 : i32
    %c0_i32_0 = arith.constant 0 : i32
    %c0_i32_1 = arith.constant 0 : i32
    return %c0_i32, %c0_i32_0 : i32, i32
  }
  func.func @transform_10(%arg0: i32, %arg1: i32, %arg2: i32) -> (i32, i32) {
    %c0_i32 = arith.constant 0 : i32
    %c0_i32_0 = arith.constant 0 : i32
    %c0_i32_1 = arith.constant 0 : i32
    return %c0_i32, %c0_i32_0 : i32, i32
  }
  func.func @transform_11(%arg0: i32, %arg1: i32, %arg2: i32) -> (i32, i32, i32) {
    %c0_i32 = arith.constant 0 : i32
    %c0_i32_0 = arith.constant 0 : i32
    return %arg0, %arg1, %c0_i32 : i32, i32, i32
  }
}

</mosaic_0001>

<bundles_post_ra>
// kernel: tpu_custom_call.1
= control target key start
LH: loop header
LB: loop body
LE: loop exit
PB: predicated region body
PF: predicated region fallthrough
CT: control target
= control target key end

     0   :  { %s2477_s0 = inlined_call_operand.vmem [shape: f32[2,8,16], index: 0, kind: input, shape index: {}]   ;;  %s2478_s1 = inlined_call_operand.vmem [shape: f32[2,16,8], index: 1, kind: input, shape index: {}]   ;;  %s2479_s2 = inlined_call_operand.vmem [shape: f32[2,4,8,8], index: 2, kind: input, shape index: {}]   ;;  %s2480_s3 = inlined_call_operand.hbm [shape: f32[2,8,8], index: 3, kind: input, shape index: {}]   ;;  %s2481_s4 = inlined_call_operand.vmem [shape: f32[8,4], index: 4, kind: input, shape index: {}]   ;;  %s2482_s5 = inlined_call_operand.vmem [shape: f32[16,8], index: 5, kind: input, shape index: {}]   ;;  %s2483_s6 = inlined_call_operand.hbm [shape: f32[8,16], index: 6, kind: input, shape index: {}]   ;;  %s2484_s7 = inlined_call_operand.hbm [shape: f32[1,8], index: 7, kind: input, shape index: {}]   ;;  %s2485_s8 = inlined_call_operand.vmem [shape: f32[16,12], index: 8, kind: input, shape index: {}]   ;;  %s2486_s9 = inlined_call_operand.hbm [shape: f32[8,12], index: 9, kind: input, shape index: {}]   ;;  %s2487_s10 = inlined_call_operand.vmem [shape: f32[1,12], index: 10, kind: input, shape index: {}]   ;;  %s2488_s11 = inlined_call_operand.hbm [shape: f32[2,8,12], index: 11, kind: output, shape index: {}]  }
   0x1   :  { %2499 = sst [smem:[#allocation20_spill]] %s2477_s0 }
   0x2   :  { %2500 = sst [smem:[#allocation21_spill]] %s2478_s1 }
   0x3   :  { %2501 = sst [smem:[#allocation22_spill]] %s2480_s3 }
   0x4   :  { %2502 = sst [smem:[#allocation23_spill]] %s2481_s4 }
   0x5   :  { %2503 = sst [smem:[#allocation24_spill]] %s2482_s5 }
   0x6   :  { %2504 = sst [smem:[#allocation25_spill]] %s2483_s6 }
   0x7   :  { %2505 = sst [smem:[#allocation26_spill]] %s2484_s7 }
   0x8   :  { %2506 = sst [smem:[#allocation27_spill]] %s2486_s9 }
   0x9   :  { %2507 = sst [smem:[#allocation28_spill]] %s2488_s11 }
   0xa   :  { %16 = vsyncpa [#allocation4], 0 }
   0xb   :  { %18 = vsyncpa [#allocation4 + $0x1], 0 }
   0xc   :  { %19 = vsyncpa [#allocation7], 0 }
   0xd   :  { %20 = vsyncpa [#allocation10], 0 }
   0xe   :  { %21 = vsyncpa [#allocation5], 0 }
   0xf   :  { %23 = vsyncpa [#allocation5 + $0x1], 0  ;;  %s1970_s17 = smov 0   ;;  %s1972_s18 = smov 0  }
  0x10   :  { %s1974_s19 = smov 0   ;;  %s1976_s20 = smov 0  }
  0x11   :  { %s1978_s21 = smov 0   ;;  %s1980_s22 = smov 0  }
  0x12 LB: > { %2508 = sst [smem:[#allocation16_spill]] %s1870_s17  ;;  %s1448_s23 = sadd.s32 4294967295, %s1890_s22   ;;  %s1890_s22 = sphi %s1980_s22, %s29_s22   ;;  %s1886_s21 = sphi %s1978_s21, %s2538_s21   ;;  %s1882_s20 = sphi %s1976_s20, %s2537_s20   ;;  %s1878_s19 = sphi %s1974_s19, %s2541_s19   ;;  %s1874_s18 = sphi %s1972_s18, %s2540_s18   ;;  %s1870_s17 = sphi %s1970_s17, %s2539_s17  }
  0x13   : > { %2509 = sst [smem:[#allocation17_spill]] %s1886_s21  ;;  %s1449_s24 = sadd.s32 4294967294, %s1890_s22  }
  0x14   : > { %p158_p0 = scmp.ne.s32.totalorder %s1874_s18, %s1870_s17  ;;  %p2004_p1 = scmp.eq.s32.totalorder %s1448_s23, 0 }
  0x15   : > { %p2008_p2 = scmp.eq.s32.totalorder %s1448_s23, 1  ;;  %p337_p3 = scmp.eq.s32.totalorder %s1449_s24, 1 }
  0x16   : > { %s2510_s25 = scalar_select %p2004_p1, 1, 0 }
  0x17   : > { %p2014_p4 = por %p2004_p1, %p158_p0  ;;  %p1450_p5 = scmp.ge.s32.totalorder %s1890_s22, 1 }
  0x18   : > { %p2019_p6 = por %p337_p3, %p158_p0  ;;  %p344_p7 = scmp.lt.s32.totalorder %s1890_s22, 3 }
  0x19   : > { %s2512_s27 = scalar_select %p2014_p4, 1, 0 }
  0x1a   : > { %s2513_s28 = scalar_select %p2019_p6, 1, 0 }
  0x1b   : > { %p2024_p8 = pnand %p1450_p5, %p344_p7  ;;  %s1892_s30 = smov [#allocation6]  }
  0x1c   : > { %2514 = sst [smem:[#allocation18_spill]] %s2513_s28  ;;  %s363_s12 = sshll.u32 %s1892_s30, 4  ;;  %s364_s12 = int_to_ptr.vmem [resolvable:$true] %s363_s12 }
  0x1d   : > { %s2515_s29 = scalar_select %p2024_p8, 1, 0 }
  0x1e   : > { %p1597_p10 = pneg %p2024_p8  ;;  %s1893_s13 = smov [#allocation8]  }
  0x1f   : > { %s374_s14 = sshll.u32 %s1893_s13, 4  ;;  %s1894_s16 = smov [#allocation9]   ;;  %s375_s14 = int_to_ptr.vmem [resolvable:$true] %s374_s14 }
  0x20   : > { %p2033_p11 = pnand %p1597_p10, %p2004_p1  ;;  %s388_s23 = sshll.u32 %s1894_s16, 4  ;;  %s2037_s23 = int_to_ptr.vmem [resolvable:$true] %s388_s23 }
  0x21   : > { %s1707_s24 = scalar_lea.vmem %s364_s12, 128  ;;  %p1715_p5 = scmp.lt.s32.totalorder %s364_s12, %s364_s12 }
  0x22   : > { %p1698_p12 = pneg %p2033_p11  ;;  %p1708_p13 = scmp.ne.s32.totalorder %s364_s12, %s1707_s24 }
  0x23   : > { %p1716_p7 = scmp.lt.s32.totalorder %s1707_s24, %s1707_s24 }
  0x24   : > { %p1710_p0 = pnand %p1708_p13, %p1698_p12 }
  0x25   : > { %p1717_p10 = por %p1716_p7, %p1715_p5 }
  0x26   : > { %p1711_p3 = pneg %p1710_p0 }
  0x28   : > { %p1718_p9 = pnand %p1717_p10, %p1711_p3 }
  0x2a   : > { %1721 = shalt.err (!%p1718_p9)
}
  0x2b   : > { %s2517_s6 = sld [smem:[#allocation25_spill]]  ;;  %s1733_s16 = scalar_lea.vmem %s375_s14, 16 }
  0x2c   : > { %p1734_p6 = scmp.ne.s32.totalorder %s375_s14, %s1733_s16  ;;  %s1740_s28 = scalar_lea.vmem %s375_s14, 32 }
  0x2d   : > { %p1741_p13 = scmp.lt.s32.totalorder %s375_s14, %s375_s14  ;;  %p1742_p0 = scmp.lt.s32.totalorder %s1740_s28, %s1733_s16 }
  0x2e   : > { %p1736_p1 = pnand %p1734_p6, %p1698_p12 }
  0x2f   : > { %p1743_p8 = por %p1742_p0, %p1741_p13 }
  0x30   : > { %p1737_p4 = pneg %p1736_p1 }
  0x31   : > { %1600 = dma.hbm_to_vmem [thread:$0]  (!%p2033_p11), %s2517_s6, 128, %s364_s12, [#allocation7]  }
  0x32   : > { %p1744_p5 = pnand %p1743_p8, %p1737_p4 }
  0x34   : > { %1747 = shalt.err (!%p1744_p5)
}
  0x35   : > { %s2518_s7 = sld [smem:[#allocation26_spill]]  ;;  %s1759_s12 = scalar_lea.vmem %s2037_s23, 128 }
  0x36   : > { %p1760_p9 = scmp.ne.s32.totalorder %s2037_s23, %s1759_s12  ;;  %p1767_p3 = scmp.lt.s32.totalorder %s2037_s23, %s2037_s23 }
  0x37   : > { %p1768_p4 = scmp.lt.s32.totalorder %s1759_s12, %s1759_s12 }
  0x38   : > { %p1762_p1 = pnand %p1760_p9, %p1698_p12 }
  0x39   : > { %p1769_p8 = por %p1768_p4, %p1767_p3 }
  0x3a   : > { %p1763_p6 = pneg %p1762_p1 }
  0x3b   : > { %1603 = dma.hbm_to_vmem [thread:$0]  (!%p2033_p11), %s2518_s7, 16, %s375_s14, [#allocation7]  }
  0x3c   : > { %p1770_p7 = pnand %p1769_p8, %p1763_p6 }
  0x3e   : > { %1773 = shalt.err (!%p1770_p7)
}
  0x3f   : > { %s2519_s9 = sld [smem:[#allocation27_spill]]  ;;  %s145_s14 = sadd.s32 1, %s1878_s19 }
  0x40   : > { %s48_s30 = sadd.s32 1, %s1886_s21  ;;  %p152_p12 = scmp.ne.s32.totalorder %s1878_s19, %s1874_s18 }
  0x41   : > { %p50_p10 = scmp.ge.s32.totalorder %s48_s30, 2  ;;  %p153_p13 = scmp.eq.s32.totalorder %s1890_s22, 0 }
  0x42   : > { %p2077_p0 = por %p2008_p2, %p152_p12  ;;  %p1618_p5 = scmp.lt.s32.totalorder %s1890_s22, 2 }
  0x43   : > { %s2543_s30 = smov (%p50_p10, %s48_s30), 0  ;;  %p154_p9 = por %p153_p13, %p152_p12 }
  0x44   : > { %2521 = sst [smem:[#allocation19_spill]] %s2543_s30  ;;  %s437_s13 = sand.u32 1, %s1878_s19  }
  0x45   : > { %1606 = dma.hbm_to_vmem [thread:$0]  (!%p2033_p11), %s2519_s9, 128, %s2037_s23, [#allocation10]  }
  0x46   : > { %s138_s16 = ssub.s32 %s1886_s21, %s2543_s30  ;;  %s1455_s23 = sshll.u32 %s437_s13, 3 }
  0x47   : > { %p143_p1 = scmp.eq.s32.totalorder %s138_s16, 0  ;;  %s1456_s24 = sshll.u32 %s1886_s21, 7 }
  0x48   : > { %s2522_s3 = sld [smem:[#allocation22_spill]]  ;;  %s441_s6 = scalar_lea.vmem [#allocation3], %s1455_s23 }
  0x49   : > { %s2089_s12 = scalar_select %p143_p1, %s1878_s19, %s145_s14  }
  0x4a   : > { %s450_s7 = sshll.u32 %s441_s6, 4  ;;  %p2096_p2 = pnand %p1618_p5, %p154_p9  ;;  %s451_s7 = int_to_ptr.vmem [resolvable:$true] %s450_s7 }
  0x4b   : > { %s438_s11 = scalar_lea.sflag [#allocation4], %s437_s13  ;;  %s1787_s16 = scalar_lea.vmem %s451_s7, 128 }
  0x4c   : > { %p1776_p11 = pneg %p2096_p2  ;;  %p1788_p6 = scmp.ne.s32.totalorder %s451_s7, %s1787_s16 }
  0x4d   : > { %s1895_s14 = smov [#allocation3]  }
  0x4e   : > { %s448_s26 = scalar_lea.hbm %s2522_s3, %s1456_s24  ;;  %p1790_p3 = pnand %p1788_p6, %p1776_p11 }
  0x4f   : > { %s1792_s30 = sshll.u32 %s1895_s14, 4  ;;  %s1793_s30 = int_to_ptr.vmem [resolvable:$false] %s1792_s30 }
  0x50   : > { %p1791_p4 = pneg %p1790_p3  ;;  %s1794_s24 = scalar_lea.vmem %s1793_s30, 256 }
  0x51   : > { %p1795_p8 = scmp.lt.s32.totalorder %s451_s7, %s1793_s30  ;;  %p1796_p7 = scmp.lt.s32.totalorder %s1794_s24, %s1787_s16 }
  0x53   : > { %p1797_p12 = por %p1796_p7, %p1795_p8 }
  0x55   : > { %p1798_p10 = pnand %p1797_p12, %p1791_p4 }
  0x57   : > { %1801 = shalt.err (!%p1798_p10)
}
  0x58   : > { %1610 = dma.hbm_to_vmem [thread:$0]  (!%p2096_p2), %s448_s26, 128, %s451_s7, %s438_s11  }
  0x59   : > { %p2524_p13 = scmp.ne.s32.totalorder %s2515_s29, 0 }
  0x5a   : > { %s2107_s6 = sand.u32 (!%p2524_p13), 1, %s1874_s18   ;;  %p2525_p5 = scmp.ne.s32.totalorder (!%p2524_p13), %s2512_s27, 0 }
  0x5b   : > { %459 = sbr.rel (%p2524_p13) target bundleno = 832 (0x340), region = 64  ;;  %s2497_s13 = sshll.u32 (!%p2524_p13), %s2107_s6, 3 }
  0x5c   : > { %s462_s23 = scalar_lea.sflag (!%p2524_p13), [#allocation4], %s2107_s6  ;;  %s2113_s30 = scalar_lea.vmem (!%p2524_p13), [#allocation3], %s2497_s13 }
  0x60   : > { %1853 = dma.done.wait (%p2525_p5), %s462_s23, 128  }
  0x61   : > { %1855 = vsyncadd (%p2525_p5), %s462_s23, 4294967168  ;;  %p2526_p9 = scmp.ne.s32.totalorder %s2510_s25, 0 }
  0x63   : > { %1857 = dma.done.wait (%p2526_p9), [#allocation7], 144  }
  0x64   : > { %1859 = vsyncadd (%p2526_p9), [#allocation7], 4294967152 }
  0x65   : > { %1861 = dma.done.wait (%p2526_p9), [#allocation10], 128  }
  0x66   : > { %1863 = vsyncadd (%p2526_p9), [#allocation10], 4294967168  ;;  %p542_p1 = scmp.lt.s32.totalorder %s1882_s20, 1  ;;  %v1896_v0 = vmov 0.0   ;;  %vm1897_vm0 = vmmov 0   ;;  %s2527_s0 = sld [smem:[#allocation20_spill]]  ;;  %v745_v53 = vlaneseq }
  0x67   : > { %1491 = vmatprep.subr.mxu0 %v1896_v0  ;;  %1495 = vmatprep.mubr.msk.f32.mxu0 %vm1897_vm0, %v1896_v0  ;;  %s2528_s1 = sld [smem:[#allocation21_spill]]  ;;  %vm592_vm1 = vcmask 130048   ;;  %v666_v6 = vld [vmem:[#allocation6] sm:$0xff]  ;;  %s1898_s25 = smov 127   ;;  %v1901_v15 = vmov 1   ;;  %v1902_v16 = vmov 0  }
  0x68   : > { %s2132_s7 = scalar_select %p542_p1, %s1882_s20, 1  ;;  %1498 = vmatprep.subr.mxu1 %v1896_v0  ;;  %1502 = vmatprep.mubr.msk.f32.mxu1 %vm1897_vm0, %v1896_v0  ;;  %v1468_v41 = vld [vmem:[#allocation8] ss:$0 sm:$0xff]  ;;  %v1903_v47 = vmov 2   ;;  %v1904_v48 = vmov 3   ;;  %v1905_v49 = vmov 4  }
  0x69   : > { %s2529_s5 = sld [smem:[#allocation24_spill]]  ;;  %s1899_s27 = smov 125   ;;  %1688 = vset.pattern.permute.xlu1 %v1901_v15  ;;  %1687 = vset.pattern.permute.xlu0 %v1902_v16  ;;  %v1906_v50 = vmov 6   ;;  %vm572_vm2 = vcmask 64512   ;;  %v1907_v51 = vmov 5   ;;  %v1908_v52 = vmov 7  }
  0x6a   : > { %s1463_s9 = sshll.u32 %s2132_s7, 3  ;;  %s1478_s11 = sshll.u32 %s2132_s7, 4  ;;  %573 = vst.msk [vmem:[#allocation2] sm:$0xff] %vm572_vm2, %v1896_v0  ;;  %v2221_v54 = vshrl.u32 %v745_v53, 7  ;;  %vm1087_vm11 = vcmask 7168   ;;  %vm1089_vm12 = vcmask 15360  }
  0x6b   : > { %s2530_s4 = sld [smem:[#allocation23_spill]]  ;;  %vm1091_vm13 = vcmask 23552   ;;  %vm1093_vm14 = vcmask 31744   ;;  %vm1095_vm15 = vcmask 39936  }
  0x6c   : > { %s548_s29 = scalar_lea.vmem %s2527_s0, %s1463_s9  ;;  %v747_v16 = vsub.s32 0, %v2221_v54 }
  0x6d   : > { %s556_s26 = scalar_lea.vmem %s2528_s1, %s1478_s11  ;;  %v2151_v3 = vld [vmem:[%s548_s29] sm:$0xff]  ;;  %s1900_s29 = smov 126  }
  0x6e   : > { %v576_v4 = vld [vmem:[%s556_s26 + $0x8] sm:$0xff]  ;;  %v575_v5 = vld [vmem:[%s556_s26] sm:$0xff] }
  0x6f   : > { %v584_v1 = vld [vmem:[%s2529_s5 + $0x8] sm:$0xff]  ;;  %v583_v2 = vld [vmem:[%s2529_s5] sm:$0xff]  ;;  %1499 = vmatpush3.msra.mxu1 %v576_v4  ;;  %v791_v4 = vsub.s32 1, %v2221_v54 }
  0x70   : > { %1492 = vmatpush3.msra.mxu0 %v584_v1  ;;  %1500 = vmatprep.subr.mxu1 %v1896_v0 }
  0x71   : > { %1493 = vmatprep.subr.mxu0 %v1896_v0  ;;  %v582_v7 = vld [vmem:[%s2530_s4] sm:$0xff]  ;;  %1501 = vmatpush3.msra.mxu1 %v575_v5 }
  0x72   : > { %1494 = vmatpush3.msra.mxu0 %v583_v2  ;;  %1517 = vpush %v582_v7  ;;  %1503 = vmatmul.mubr.msk.f32.vlgmr.msra.gmra.mxu1 %vm592_vm1, %v666_v6  ;;  %v794_v8 = vrot.slane %v582_v7, 1  ;;  %v837_v9 = vrot.slane %v582_v7, 2  ;;  %v880_v10 = vrot.slane %v582_v7, 3  ;;  %v923_v11 = vrot.slane %v582_v7, 4 }
  0x73   : > { %1496 = vmatmul.mubr.msk.f32.vlgmr.msra.gmra.mxu0 %vm592_vm1, %v2151_v3  ;;  %756 = vrot.lane.b32.xlu0 %v582_v7, %s1898_s25  ;;  %v966_v12 = vrot.slane %v582_v7, 5  ;;  %v1009_v13 = vrot.slane %v582_v7, 6  ;;  %v1052_v14 = vrot.slane %v582_v7, 7 }
  0x74   : > { %770 = vrot.lane.b32.xlu1 %v582_v7, %s1899_s27  ;;  %1510 = vmatprep.subr.mxu1 %v1896_v0 }
  0x75   : > { %1505 = vmatprep.subr.mxu0 %v1896_v0  ;;  %1514 = vmatprep.mubr.msk.f32.mxu1 %vm1897_vm0, %v1896_v0 }
  0x76   : > { %1507 = vmatprep.mubr.msk.f32.mxu0 %vm1897_vm0, %v1896_v0  ;;  %vm1097_vm0 = vcmask 48128  }
  0x77   : > { %763 = vrot.lane.b32.xlu0 %v582_v7, %s1900_s29 }
  0x78   : > { %800 = vrot.lane.b32.xlu1 %v794_v8, %s1898_s25 }
  0x7b   : > { %807 = vrot.lane.b32.xlu0 %v794_v8, %s1900_s29 }
  0x7c   : > { %814 = vrot.lane.b32.xlu1 %v794_v8, %s1899_s27 }
  0x7f   : > { %843 = vrot.lane.b32.xlu0 %v837_v9, %s1898_s25 }
  0x80   : > { %850 = vrot.lane.b32.xlu1 %v837_v9, %s1900_s29 }
  0x83   : > { %857 = vrot.lane.b32.xlu0 %v837_v9, %s1899_s27 }
  0x84   : > { %886 = vrot.lane.b32.xlu1 %v880_v10, %s1898_s25 }
  0x87   : > { %893 = vrot.lane.b32.xlu0 %v880_v10, %s1900_s29 }
  0x88   : > { %900 = vrot.lane.b32.xlu1 %v880_v10, %s1899_s27 }
  0x8b   : > { %929 = vrot.lane.b32.xlu0 %v923_v11, %s1898_s25 }
  0x8c   : > { %936 = vrot.lane.b32.xlu1 %v923_v11, %s1900_s29 }
  0x8f   : > { %943 = vrot.lane.b32.xlu0 %v923_v11, %s1899_s27 }
  0x90   : > { %972 = vrot.lane.b32.xlu1 %v966_v12, %s1898_s25 }
  0x93   : > { %979 = vrot.lane.b32.xlu0 %v966_v12, %s1900_s29 }
  0x94   : > { %986 = vrot.lane.b32.xlu1 %v966_v12, %s1899_s27 }
  0x97   : > { %1015 = vrot.lane.b32.xlu0 %v1009_v13, %s1898_s25 }
  0x98   : > { %1022 = vrot.lane.b32.xlu1 %v1009_v13, %s1900_s29 }
  0x9b   : > { %1029 = vrot.lane.b32.xlu0 %v1009_v13, %s1899_s27 }
  0x9c   : > { %1058 = vrot.lane.b32.xlu1 %v1052_v14, %s1898_s25 }
  0x9f   : > { %1065 = vrot.lane.b32.xlu0 %v1052_v14, %s1900_s29  ;;  %s1479_s29 = sshll.u32 %s2132_s7, 5 }
  0xa0   : > { %1072 = vrot.lane.b32.xlu1 %v1052_v14, %s1899_s27  ;;  %s567_s4 = scalar_lea.vmem %s2479_s2, %s1479_s29 }
  0xa1   : > { %v2223_v55 = vld [vmem:[%s567_s4] sm:$0xff]  ;;  %v2228_v57 = vld [vmem:[%s567_s4 + $0x8] sm:$0xff]  ;;  %v2231_v59 = vld [vmem:[%s567_s4 + $0x10] sm:$0xff] }
  0xa2   : > { %v2236_v61 = vld [vmem:[%s567_s4 + $0x18] sm:$0xff] }
  0xa3   : > { %s2187_s17 = spop %1517 }
  0xa4   : > { %v752_v56 = vstv %s2187_s17 }
  0xa5   : > { %v2241_v1 = vmul.f32 %v752_v56, %v2223_v55 }
  0xe5   : > { %v757_v17 = vpop.permute.xlu0 %756 }
  0xe6   : > { %v771_v18 = vpop.permute.xlu1 %770  ;;  %1519 = vpush %v757_v17 }
  0xe9   : > { %v764_v19 = vpop.permute.xlu0 %763 }
  0xea   : > { %v801_v20 = vpop.permute.xlu1 %800  ;;  %1521 = vpush %v764_v19 }
  0xeb   : > { %1523 = vpush %v771_v18 }
  0xec   : > { %1525 = vpush %v794_v8 }
  0xed   : > { %v808_v21 = vpop.permute.xlu0 %807  ;;  %1527 = vpush %v801_v20 }
  0xee   : > { %v815_v22 = vpop.permute.xlu1 %814  ;;  %1529 = vpush %v808_v21 }
  0xef   : > { %1531 = vpush %v815_v22 }
  0xf0   : > { %1533 = vpush %v837_v9 }
  0xf1   : > { %v844_v23 = vpop.permute.xlu0 %843 }
  0xf2   : > { %v851_v24 = vpop.permute.xlu1 %850  ;;  %1535 = vpush %v844_v23 }
  0xf3   : > { %1537 = vpush %v851_v24  ;;  %v834_v24 = vsub.s32 2, %v2221_v54 }
  0xf5   : > { %v858_v25 = vpop.permute.xlu0 %857 }
  0xf6   : > { %v887_v26 = vpop.permute.xlu1 %886  ;;  %1539 = vpush %v858_v25 }
  0xf7   : > { %1541 = vpush %v880_v10 }
  0xf8   : > { %1543 = vpush %v887_v26 }
  0xf9   : > { %v894_v27 = vpop.permute.xlu0 %893 }
  0xfa   : > { %v901_v28 = vpop.permute.xlu1 %900  ;;  %1545 = vpush %v894_v27 }
  0xfb   : > { %1547 = vpush %v901_v28  ;;  %v877_v28 = vsub.s32 3, %v2221_v54 }
  0xfc   : > { %1549 = vpush %v923_v11 }
  0xfd   : > { %v930_v29 = vpop.permute.xlu0 %929 }
  0xfe   : > { %v937_v30 = vpop.permute.xlu1 %936  ;;  %1551 = vpush %v930_v29 }
  0xff   : > { %1553 = vpush %v937_v30 }
 0x101   : > { %v944_v31 = vpop.permute.xlu0 %943 }
 0x102   : > { %v973_v32 = vpop.permute.xlu1 %972  ;;  %1555 = vpush %v944_v31 }
 0x103   : > { %1557 = vpush %v966_v12 }
 0x104   : > { %1559 = vpush %v973_v32 }
 0x105   : > { %v980_v33 = vpop.permute.xlu0 %979 }
 0x106   : > { %v987_v34 = vpop.permute.xlu1 %986  ;;  %1561 = vpush %v980_v33 }
 0x107   : > { %1563 = vpush %v987_v34 }
 0x108   : > { %1565 = vpush %v1009_v13 }
 0x109   : > { %v1016_v35 = vpop.permute.xlu0 %1015 }
 0x10a   : > { %1567 = vpush %v1016_v35  ;;  %v1023_v36 = vpop.permute.xlu1 %1022  ;;  %v920_v35 = vsub.s32 4, %v2221_v54 }
 0x10b   : > { %1569 = vpush %v1023_v36  ;;  %v1006_v36 = vsub.s32 6, %v2221_v54 }
 0x10d   : > { %v1030_v37 = vpop.permute.xlu0 %1029 }
 0x10e   : > { %1571 = vpush %v1030_v37  ;;  %v1059_v38 = vpop.permute.xlu1 %1058 }
 0x10f   : > { %1573 = vpush %v1052_v14 }
 0x110   : > { %1575 = vpush %v1059_v38 }
 0x111   : > { %v1066_v39 = vpop.permute.xlu0 %1065 }
 0x112   : > { %1577 = vpush %v1066_v39  ;;  %v1073_v40 = vpop.permute.xlu1 %1072 }
 0x113   : > { %1579 = vpush %v1073_v40  ;;  %v963_v40 = vsub.s32 5, %v2221_v54 }
 0x117   : > { %s2189_s28 = spop %1519 }
 0x118   : > { %v759_v58 = vstv %s2189_s28 }
 0x119   : > { %v2248_v5 = vmul.f32 %v759_v58, %v2228_v57 }
 0x11b   : > { %s2191_s26 = spop %1521 }
 0x11c   : > { %s2193_s16 = spop %1523  ;;  %v766_v60 = vstv %s2191_s26 }
 0x11d   : > { %s2195_s14 = spop %1525  ;;  %v773_v62 = vstv %s2193_s16  ;;  %v2256_v9 = vmul.f32 %v766_v60, %v2231_v59 }
 0x11e   : > { %s2197_s24 = spop %1527  ;;  %v796_v63 = vstv %s2195_s14  ;;  %v2259_v10 = vmul.f32 %v773_v62, %v2236_v61 }
 0x11f   : > { %s2199_s23 = spop %1529  ;;  %v803_v2 = vstv %s2197_s24  ;;  %v798_v11 = vmul.f32 %v796_v63, %v2223_v55 }
 0x120   : > { %s2201_s9 = spop %1531  ;;  %v810_v6 = vstv %s2199_s23  ;;  %v805_v13 = vmul.f32 %v803_v2, %v2228_v57 }
 0x121   : > { %s2203_s11 = spop %1533  ;;  %v817_v7 = vstv %s2201_s9  ;;  %v2272_v17 = vmul.f32 %v810_v6, %v2231_v59 }
 0x122   : > { %v839_v8 = vstv %s2203_s11  ;;  %v2275_v18 = vmul.f32 %v817_v7, %v2236_v61 }
 0x123   : > { %s2205_s25 = spop %1535  ;;  %v2278_v19 = vmul.f32 %v839_v8, %v2223_v55 }
 0x124   : > { %s2207_s27 = spop %1537  ;;  %v846_v12 = vstv %s2205_s25 }
 0x125   : > { %v853_v14 = vstv %s2207_s27  ;;  %v2282_v21 = vmul.f32 %v846_v12, %v2228_v57 }
 0x126   : > { %v2290_v25 = vmul.f32 %v853_v14, %v2231_v59 }
 0x127   : > { %s2210_s13 = spop %1539 }
 0x128   : > { %s2212_s0 = spop %1541  ;;  %v860_v15 = vstv %s2210_s13 }
 0x129   : > { %s2217_s5 = spop %1543  ;;  %v882_v20 = vstv %s2212_s0  ;;  %v2293_v26 = vmul.f32 %v860_v15, %v2236_v61 }
 0x12a   : > { %v889_v22 = vstv %s2217_s5  ;;  %v884_v29 = vmul.f32 %v882_v20, %v2223_v55 }
 0x12b   : > { %s2219_s21 = spop %1545  ;;  %v891_v33 = vmul.f32 %v889_v22, %v2228_v57 }
 0x12c   : > { %s2226_s7 = spop %1547  ;;  %v896_v23 = vstv %s2219_s21 }
 0x12d   : > { %s2233_s1 = spop %1549  ;;  %v903_v27 = vstv %s2226_s7  ;;  %v2305_v34 = vmul.f32 %v896_v23, %v2231_v59 }
 0x12e   : > { %v2310_v37 = vmul.f32 %v903_v27, %v2236_v61 }
 0x12f   : > { %s2245_s3 = spop %1551 }
 0x130   : > { %s2253_s4 = spop %1553  ;;  %v932_v32 = vstv %s2245_s3  ;;  %s1475_s3 = sshll.u32 %s1882_s20, 7 }
 0x131   : > { %v939_v38 = vstv %s2253_s4  ;;  %s2531_s4 = sshll.u32 %s2107_s6, 3  ;;  %s1909_s20 = smov [#allocation11]  }
 0x132   : > { %v2183_v44 = vpop.f32.mrf.mxu1 }
 0x133   : > { %v662_v42 = vpop.f32.mrf.mxu0  ;;  %s2263_s17 = spop %1555  ;;  %v792_v30 = vrot.slane %v2183_v44, %v791_v4  ;;  %v748_v31 = vrot.slane %v2183_v44, %v747_v16  ;;  %v835_v39 = vrot.slane %v2183_v44, %v834_v24  ;;  %v921_v56 = vrot.slane %v2183_v44, %v920_v35 }
 0x134   : > { %v663_v43 = vadd.f32 %v1468_v41, %v662_v42  ;;  %v1504_v46 = vpop.f32.mrf.mxu1  ;;  %s2269_s28 = spop %1557  ;;  %v1007_v58 = vrot.slane %v2183_v44, %v1006_v36  ;;  %v964_v63 = vrot.slane %v2183_v44, %v963_v40 }
 0x135   : > { %v1497_v45 = vpop.f32.mrf.mxu0  ;;  %s2287_s13 = spop %1559  ;;  %v878_v46 = vrot.slane %v2183_v44, %v877_v28  ;;  %v968_v53 = vstv %s2269_s28 }
 0x136   : > { %786 = vperm.xlu1 %1688, %v663_v43   ;;  %742 = vperm.xlu0 %1687, %v663_v43   ;;  %v2319_v45 = vmul.f32 %v932_v32, %v2228_v57  ;;  %v970_v14 = vmul.f32 %v968_v53, %v2223_v55 }
 0x137   : > { %s2301_s0 = spop %1561 }
 0x138   : > { %s2314_s5 = spop %1563  ;;  %v982_v6 = vstv %s2301_s0 }
 0x139   : > { %s2325_s21 = spop %1565  ;;  %v989_v15 = vstv %s2314_s5  ;;  %s2532_s5 = sld [smem:[#allocation28_spill]] }
 0x13a   : > { %1689 = vset.pattern.permute.xlu1 %v1903_v47  ;;  %1690 = vset.pattern.permute.xlu0 %v1904_v48  ;;  %v1049_v47 = vsub.s32 7, %v2221_v54  ;;  %v1011_v22 = vstv %s2325_s21 }
 0x13b   : > { %829 = vperm.xlu1 %1689, %v663_v43   ;;  %872 = vperm.xlu0 %1690, %v663_v43   ;;  %s1568_s26 = spop %1567  ;;  %v1013_v32 = vmul.f32 %v1011_v22, %v2223_v55 }
 0x13c   : > { %s2335_s16 = spop %1569  ;;  %v2346_v7 = vrot.slane %v2183_v44, %v1049_v47  ;;  %v1018_v23 = vstv %s1568_s26  ;;  %s1267_s26 = scalar_lea.sflag [#allocation5], %s2107_s6 }
 0x13d   : > { %v1025_v28 = vstv %s2335_s16  ;;  %v1020_v35 = vmul.f32 %v1018_v23, %v2228_v57 }
 0x13f   : > { %1691 = vset.pattern.permute.xlu1 %v1905_v49  ;;  %1693 = vset.pattern.permute.xlu0 %v1906_v50  ;;  %v946_v50 = vstv %s2263_s17  ;;  %s1572_s14 = spop %1571  ;;  %s541_s17 = scalar_lea.vmem [#allocation11], %s2531_s4 }
 0x140   : > { %915 = vperm.xlu1 %1691, %v663_v43   ;;  %1001 = vperm.xlu0 %1693, %v663_v43   ;;  %v2339_v2 = vmul.f32 %v946_v50, %v2236_v61  ;;  %s2369_s24 = spop %1573  ;;  %s1281_s28 = sshll.u32 %s541_s17, 4  ;;  %s1282_s28 = int_to_ptr.vmem [resolvable:$true] %s1281_s28 }
 0x141   : > { %s2376_s23 = spop %1575  ;;  %s2435_s21 = scalar_lea.hbm %s2532_s5, %s1475_s3 }
 0x142   : > { %s1802_s16 = scalar_lea.vmem %s1282_s28, 128 }
 0x143   : > { %p1803_p2 = scmp.ne.s32.totalorder %s1282_s28, %s1802_s16 }
 0x144   : > { %1692 = vset.pattern.permute.xlu1 %v1907_v51  ;;  %1695 = vset.pattern.permute.xlu0 %v1908_v52  ;;  %v975_v51 = vstv %s2287_s13 }
 0x145   : > { %958 = vperm.xlu1 %1692, %v663_v43   ;;  %v2342_v4 = vmul.f32 %v975_v51, %v2228_v57  ;;  %p1804_p11 = pnand %p1803_p2, %p2077_p0 }
 0x147   : > { %p1805_p6 = pneg %p1804_p11 }
 0x149   : > { %1694 = vset.pattern.permute.xlu1 %v1908_v52  ;;  %v2328_v52 = vmul.f32 %v939_v38, %v2231_v59 }
 0x14a   : > { %1044 = vperm.xlu1 %1694, %v663_v43   ;;  %v925_v43 = vstv %s2233_s1 }
 0x14b   : > { %v927_v62 = vmul.f32 %v925_v43, %v2223_v55  ;;  %v2372_v43 = vld [vmem:[%s2113_s30] sm:$0xff]  ;;  %s2386_s30 = spop %1577 }
 0x14c   : > { %s2390_s9 = spop %1579 }
 0x1b1   : > { %v787_v41 = vpop.permute.xlu1 %786  ;;  %v743_v42 = vpop.permute.xlu0 %742 }
 0x1b2   : > { %v793_v48 = vadd.f32 %v792_v30, %v787_v41  ;;  %v749_v49 = vadd.f32 %v748_v31, %v743_v42  ;;  %v1032_v30 = vstv %s1572_s14  ;;  %v2360_v31 = vmul.f32 %v989_v15, %v2236_v61  ;;  %s1806_s14 = sshll.u32 %s1909_s20, 4  ;;  %s1807_s14 = int_to_ptr.vmem [resolvable:$false] %s1806_s14 }
 0x1b3   : > { %v1034_v40 = vmul.f32 %v1032_v30, %v2236_v61  ;;  %p1809_p3 = scmp.lt.s32.totalorder %s1282_s28, %s1807_s14 }
 0x1b4   : > { %v799_v60 = vadd.f32 %v798_v11, %v793_v48  ;;  %v755_v54 = vadd.f32 %v2241_v1, %v749_v49  ;;  %v1054_v49 = vstv %s2369_s24  ;;  %s1808_s24 = scalar_lea.vmem %s1807_s14, 256 }
 0x1b5   : > { %p1810_p4 = scmp.lt.s32.totalorder %s1808_s24, %s1802_s16 }
 0x1b6   : > { %v806_v1 = vadd.f32 %v805_v13, %v799_v60  ;;  %v762_v8 = vadd.f32 %v2248_v5, %v755_v54  ;;  %v830_v11 = vpop.permute.xlu1 %829  ;;  %v873_v12 = vpop.permute.xlu0 %872  ;;  %v2357_v5 = vmul.f32 %v982_v6, %v2231_v59  ;;  %v1061_v54 = vstv %s2376_s23 }
 0x1b7   : > { %v836_v16 = vadd.f32 %v835_v39, %v830_v11  ;;  %v879_v20 = vadd.f32 %v878_v46, %v873_v12  ;;  %v1027_v39 = vmul.f32 %v1025_v28, %v2231_v59  ;;  %v1075_v28 = vstv %s2390_s9  ;;  %p1811_p8 = por %p1810_p4, %p1809_p3 }
 0x1b8   : > { %v813_v24 = vadd.f32 %v2272_v17, %v806_v1  ;;  %v769_v27 = vadd.f32 %v2256_v9, %v762_v8 }
 0x1b9   : > { %v842_v44 = vadd.f32 %v2278_v19, %v836_v16  ;;  %v885_v13 = vadd.f32 %v884_v29, %v879_v20  ;;  %v1063_v16 = vmul.f32 %v1061_v54, %v2228_v57  ;;  %p1812_p7 = pnand %p1811_p8, %p1805_p6 }
 0x1ba   : > { %v820_v17 = vadd.f32 %v2275_v18, %v813_v24  ;;  %v776_v9 = vadd.f32 %v2259_v10, %v769_v27  ;;  %v1068_v27 = vstv %s2386_s30 }
 0x1bb   : > { %v849_v36 = vadd.f32 %v2282_v21, %v842_v44  ;;  %v892_v38 = vadd.f32 %v891_v33, %v885_v13  ;;  %v916_v19 = vpop.permute.xlu1 %915  ;;  %v1002_v29 = vpop.permute.xlu0 %1001 }
 0x1bc   : > { %v922_v41 = vadd.f32 %v921_v56, %v916_v19  ;;  %v1008_v42 = vadd.f32 %v1007_v58, %v1002_v29  ;;  %vm821_vm3 = vcmp.gt.f32.partialorder %v820_v17, 0.0  ;;  %v822_v18 = vmul.f32 0.01, %v820_v17 }
 0x1bd   : > { %v856_v10 = vadd.f32 %v2290_v25, %v849_v36  ;;  %v899_v21 = vadd.f32 %v2305_v34, %v892_v38  ;;  %vm777_vm4 = vcmp.gt.f32.partialorder %v776_v9, 0.0  ;;  %v778_v33 = vmul.f32 0.01, %v776_v9 }
 0x1be   : > { %v928_v46 = vadd.f32 %v927_v62, %v922_v41  ;;  %v1014_v47 = vadd.f32 %v1013_v32, %v1008_v42  ;;  %v823_v48 = vsel %vm821_vm3, %v820_v17, %v822_v18  ;;  %v1070_v32 = vmul.f32 %v1068_v27, %v2231_v59 }
 0x1bf   : > { %v824_v50 = vmul.f32 %v823_v48, %v2372_v43  ;;  %v779_v51 = vsel %vm777_vm4, %v776_v9, %v778_v33  ;;  %v863_v53 = vadd.f32 %v2293_v26, %v856_v10  ;;  %v906_v56 = vadd.f32 %v2310_v37, %v899_v21  ;;  %v1107_v33 = vld [vmem:[%s2485_s8 + $0x8] sm:$0xff] }
 0x1c0   : > { %v935_v25 = vadd.f32 %v2319_v45, %v928_v46  ;;  %v1021_v58 = vadd.f32 %v1020_v35, %v1014_v47  ;;  %v959_v34 = vpop.permute.xlu1 %958  ;;  %v780_v60 = vmul.f32 %v779_v51, %v2372_v43  ;;  %v1056_v45 = vmul.f32 %v1054_v49, %v2223_v55  ;;  %v1109_v46 = vld [vmem:[#allocation9] sm:$0xff]  ;;  %1511 = vmatpush3.msra.mxu1 %v1107_v33 }
 0x1c1   : > { %v965_v6 = vadd.f32 %v964_v63, %v959_v34  ;;  %v825_v62 = vsel %vm572_vm2, %v824_v50, 0.0  ;;  %vm864_vm5 = vcmp.gt.f32.partialorder %v863_v53, 0.0  ;;  %v865_v1 = vmul.f32 0.01, %v863_v53  ;;  %v1106_v47 = vld [vmem:[%s2485_s8] sm:$0xff]  ;;  %1506 = vmatpush3.msra.mxu0 %v1109_v46  ;;  %1512 = vmatprep.subr.mxu1 %v1896_v0 }
 0x1c2   : > { %v942_v8 = vadd.f32 %v2328_v52, %v935_v25  ;;  %v1028_v11 = vadd.f32 %v1027_v39, %v1021_v58  ;;  %826 = vadd.xlane.f32.xlu0 %v825_v62  ;;  %v782_v26 = vsel %vm572_vm2, %v780_v60, 0.0  ;;  %vm907_vm6 = vcmp.gt.f32.partialorder %v906_v56, 0.0  ;;  %1513 = vmatpush3.msra.mxu1 %v1106_v47 }
 0x1c3   : > { %v971_v37 = vadd.f32 %v970_v14, %v965_v6  ;;  %783 = vadd.xlane.f32.xlu1 %v782_v26  ;;  %v866_v63 = vsel %vm864_vm5, %v863_v53, %v865_v1  ;;  %v908_v12 = vmul.f32 0.01, %v906_v56  ;;  %v1077_v36 = vmul.f32 %v1075_v28, %v2236_v61  ;;  %1515 = vmatmul.mubr.msk.f32.vlgmr.msra.gmra.mxu1 %vm592_vm1, %v2151_v3  ;;  %v1086_v3 = vld [vmem:[#allocation2] sm:$0xff] }
 0x1c4   : > { %v1035_v15 = vadd.f32 %v1034_v40, %v1028_v11  ;;  %v867_v52 = vmul.f32 %v866_v63, %v2372_v43  ;;  %v949_v20 = vadd.f32 %v2339_v2, %v942_v8  ;;  %vm1099_vm3 = vcmask 56320  }
 0x1c5   : > { %v978_v22 = vadd.f32 %v2342_v4, %v971_v37  ;;  %v1045_v23 = vpop.permute.xlu1 %1044  ;;  %v909_v24 = vsel %vm907_vm6, %v906_v56, %v908_v12  ;;  %vm1264_vm4 = vcmask 97280  }
 0x1c6   : > { %v1051_v14 = vadd.f32 %v2346_v7, %v1045_v23  ;;  %v868_v30 = vsel %vm572_vm2, %v867_v52, 0.0  ;;  %v910_v55 = vmul.f32 %v909_v24, %v2372_v43  ;;  %vm950_vm7 = vcmp.gt.f32.partialorder %v949_v20, 0.0 }
 0x1c7   : > { %v985_v44 = vadd.f32 %v2357_v5, %v978_v22  ;;  %869 = vadd.xlane.f32.xlu0 %v868_v30  ;;  %v951_v57 = vmul.f32 0.01, %v949_v20  ;;  %vm1036_vm8 = vcmp.gt.f32.partialorder %v1035_v15, 0.0  ;;  %v1037_v13 = vmul.f32 0.01, %v1035_v15 }
 0x1c8   : > { %v1057_v2 = vadd.f32 %v1056_v45, %v1051_v14  ;;  %v911_v4 = vsel %vm572_vm2, %v910_v55, 0.0  ;;  %v1473_v45 = vld [vmem:[%s2487_s10] ss:$0 sm:$0xff] }
 0x1c9   : > { %912 = vadd.xlane.f32.xlu1 %v911_v4  ;;  %v952_v35 = vsel %vm950_vm7, %v949_v20, %v951_v57  ;;  %v1038_v17 = vsel %vm1036_vm8, %v1035_v15, %v1037_v13  ;;  %v992_v7 = vadd.f32 %v2360_v31, %v985_v44 }
 0x1ca   : > { %v1064_v9 = vadd.f32 %v1063_v16, %v1057_v2  ;;  %v953_v38 = vmul.f32 %v952_v35, %v2372_v43  ;;  %v1039_v39 = vmul.f32 %v1038_v17, %v2372_v43 }
 0x1cb   : > { %vm993_vm9 = vcmp.gt.f32.partialorder %v992_v7, 0.0  ;;  %v994_v5 = vmul.f32 0.01, %v992_v7 }
 0x1cc   : > { %v1071_v19 = vadd.f32 %v1070_v32, %v1064_v9  ;;  %v954_v29 = vsel %vm572_vm2, %v953_v38, 0.0  ;;  %v1040_v31 = vsel %vm572_vm2, %v1039_v39, 0.0 }
 0x1cd   : > { %955 = vadd.xlane.f32.xlu0 %v954_v29  ;;  %v995_v40 = vsel %vm993_vm9, %v992_v7, %v994_v5 }
 0x1ce   : > { %v1078_v59 = vadd.f32 %v1077_v36, %v1071_v19  ;;  %v996_v41 = vmul.f32 %v995_v40, %v2372_v43 }
 0x1d0   : > { %v1080_v42 = vmul.f32 0.01, %v1078_v59  ;;  %v997_v18 = vsel %vm572_vm2, %v996_v41, 0.0  ;;  %vm1079_vm10 = vcmp.gt.f32.partialorder %v1078_v59, 0.0 }
 0x1d1   : > { %1041 = vadd.xlane.f32.xlu0 %v1040_v31  ;;  %998 = vadd.xlane.f32.xlu1 %v997_v18 }
 0x1d2   : > { %v1081_v61 = vsel %vm1079_vm10, %v1078_v59, %v1080_v42 }
 0x1d3   : > { %v1082_v10 = vmul.f32 %v1081_v61, %v2372_v43 }
 0x1d5   : > { %v1083_v21 = vsel %vm572_vm2, %v1082_v10, 0.0 }
 0x1d6   : > { %1084 = vadd.xlane.f32.xlu1 %v1083_v21 }
 0x24b   : > { %v827_v43 = vpop.xlane.xlu0 %826 }
 0x24c   : > { %v784_v48 = vpop.xlane.xlu1 %783 }
 0x24d   : > { %v1088_v50 = vsel %vm1087_vm11, %v784_v48, %v827_v43 }
 0x250   : > { %v870_v49 = vpop.xlane.xlu0 %869 }
 0x251   : > { %v1090_v53 = vsel %vm1089_vm12, %v1088_v50, %v870_v49 }
 0x252   : > { %v913_v51 = vpop.xlane.xlu1 %912 }
 0x253   : > { %v1092_v25 = vsel %vm1091_vm13, %v1090_v53, %v913_v51 }
 0x256   : > { %v956_v56 = vpop.xlane.xlu0 %955 }
 0x257   : > { %v1094_v34 = vsel %vm1093_vm14, %v1092_v25, %v956_v56 }
 0x25a   : > { %v999_v58 = vpop.xlane.xlu1 %998  ;;  %v1042_v60 = vpop.xlane.xlu0 %1041 }
 0x25b   : > { %v1096_v0 = vsel %vm1095_vm15, %v1094_v34, %v999_v58 }
 0x25c   : > { %v1098_v6 = vsel %vm1097_vm0, %v1096_v0, %v1042_v60 }
 0x25f   : > { %v1085_v54 = vpop.xlane.xlu1 %1084 }
 0x260   : > { %v1100_v62 = vsel %vm1099_vm3, %v1098_v6, %v1085_v54 }
 0x261   : > { %v1101_v1 = vadd.f32 %v1100_v62, %v1086_v3 }
 0x263   : > { %1102 = vst.msk [vmem:[#allocation2] sm:$0xff] %vm572_vm2, %v1101_v1 }
 0x26a   : > { %v1108_v8 = vld [vmem:[#allocation2] sm:$0xff] }
 0x26b   : > { %1508 = vmatmul.mubr.msk.f32.vlgmr.msra.gmra.mxu0 %vm572_vm2, %v1108_v8 }
 0x283   : > { %v1249_v11 = vpop.f32.mrf.mxu1 }
 0x285   : > { %v1516_v26 = vpop.f32.mrf.mxu1 }
 0x32b   : > { %v1179_v37 = vpop.f32.mrf.mxu0 }
 0x32c   : > { %v1250_v63 = vadd.f32 %v1249_v11, %v1179_v37 }
 0x32d   : > { %v1509_v12 = vpop.f32.mrf.mxu0 }
 0x32e   : > { %v1260_v15 = vadd.f32 %v1473_v45, %v1250_v63 }
 0x330   : > { %vm1261_vm1 = vcmp.gt.f32.partialorder %v1260_v15, 0.0  ;;  %v1262_v16 = vmul.f32 0.01, %v1260_v15 }
 0x332   : > { %v1263_v52 = vsel %vm1261_vm1, %v1260_v15, %v1262_v16 }
 0x333   : > { %1265 = vst.msk [vmem:[%s541_s17] sm:$0xff] %vm1264_vm4, %v1263_v52 }
 0x334   : > { %1815 = shalt.err (!%p1812_p7)
}
 0x335   : > { %s1816_s23 = scalar_lea.hbm %s2435_s21, 128  ;;  %s1820_s9 = scalar_lea.hbm %s2532_s5, 256 }
 0x336   : > { %p1817_p12 = scmp.ne.s32.totalorder %s2435_s21, %s1816_s23  ;;  %p1821_p5 = scmp.lt.s32.totalorder %s2435_s21, %s2532_s5 }
 0x337   : > { %p1822_p9 = scmp.lt.s32.totalorder %s1820_s9, %s1816_s23 }
 0x338   : > { %p1818_p10 = pnand %p1817_p12, %p2077_p0 }
 0x339   : > { %p1823_p1 = por %p1822_p9, %p1821_p5 }
 0x33a   : > { %p1819_p13 = pneg %p1818_p10 }
 0x33c   : > { %p1824_p2 = pnand %p1823_p1, %p1819_p13 }
 0x33e   : > { %1827 = shalt.err (!%p1824_p2)
}
 0x33f   : > { %1595 = dma.vmem_to_hbm [thread:$0]  (%p2077_p0), %s1282_s28, 128, %s2435_s21, %s1267_s26  }
 0x340 PF: > { %s2533_s27 = sld [smem:[#allocation16_spill]]  ;;  %p2536_p6 = scmp.ge.s32.totalorder %s1890_s22, 2 }
 0x341   : > { %s2534_s29 = sld [smem:[#allocation18_spill]] }
 0x346   : > { %s1293_s7 = sand.u32 1, %s2533_s27  }
 0x347   : > { %p2535_p11 = scmp.ne.s32.totalorder %s2534_s29, 0  ;;  %s1294_s1 = scalar_lea.sflag [#allocation5], %s1293_s7 }
 0x349   : > { %p1612_p3 = pnand %p2536_p6, %p2535_p11 }
 0x34b   : > { %p1613_p4 = pneg %p1612_p3 }
 0x34d   : > { %1865 = dma.done.wait (%p1613_p4), %s1294_s1, 128  }
 0x34e   : > { %1867 = vsyncadd (%p1613_p4), %s1294_s1, 4294967168  ;;  %s29_s22 = sadd.s32 1, %s1890_s22   ;;  %s2537_s20 = sld [smem:[#allocation17_spill]] }
 0x34f   : > { %p26_p8 = scmp.ge.s32.totalorder %s29_s22, 4   ;;  %s2538_s21 = sld [smem:[#allocation19_spill]] }
 0x350   : > { %s2539_s17 = smov %s1874_s18  ;;  %s2540_s18 = smov %s1878_s19 }
 0x351   : > { %s2541_s19 = smov %s2089_s12  ;;  %28 = sbr.rel (!%p26_p8) target bundleno = 18 (0x12), region = 138 }
 0x356   :  { %1299 = vsyncpa [#allocation4], 1 }
 0x357   :  { %1301 = vsyncpa [#allocation4 + $0x1], 1 }
 0x358   :  { %1302 = vsyncpa [#allocation7], 1 }
 0x359   :  { %1303 = vsyncpa [#allocation10], 1 }
 0x35a   :  { %1304 = vsyncpa [#allocation5], 1 }
 0x35b   :  { %1306 = vsyncpa [#allocation5 + $0x1], 1 }

</bundles_post_ra>
